<compile_context>
chip_gen: v5e
topology: v5e:2x2
jax: 0.10.0
libtpu: 0.0.40
codegen_flags: <defaults>
</compile_context>

<pallas_src>
import functools

import jax
import jax.numpy as jnp
from jax import lax
from jax.experimental import pallas as pl
from jax.experimental.pallas import tpu as pltpu

EPS = 1e-5


def _bn_train(x, gamma=None, beta=None):
    # PyTorch BatchNorm1d training mode on a 2D input: biased variance over batch.
    mean = jnp.mean(x, axis=0, keepdims=True)
    var = jnp.mean((x - mean) ** 2, axis=0, keepdims=True)
    xn = (x - mean) * lax.rsqrt(var + EPS)
    if gamma is not None:
        xn = xn * gamma + beta
    return xn


def _barlow_kernel(x_ref, wb_ref, w0_ref, bn_ref, w1_ref, w2_ref,
                   loss_ref, feat_ref, *, batch_size, lambd):
    """Fused BarlowTwins forward.

    grid = (n_tiles,) over the backbone weight's column tiles.
      x_ref    : (2B, D_in)  bf16   stacked [branch1; branch2] flattened inputs
      wb_ref   : (D_in, TN)  bf16   column tile of the zero-padded backbone weight
      w0_ref   : (Dp, H)     f32    projector layer 0 (rows zero-padded to Dp)
      bn_ref   : (4, H)      f32    rows = [gamma0, beta0, gamma1, beta1]
      w1_ref   : (H, H)      f32
      w2_ref   : (H, P)      f32
      loss_ref : (1, 1)      f32    output
      feat_ref : (2B, Dp)    f32    VMEM scratch: backbone features (accumulated)
    """
    j = pl.program_id(0)
    tn = wb_ref.shape[1]

    # Backbone column tile: (2B, D_in) @ (D_in, TN) -> (2B, TN), lane-aligned store.
    col = pl.multiple_of(j * tn, tn)
    feat_ref[:, pl.ds(col, tn)] = jnp.dot(
        x_ref[...], wb_ref[...], preferred_element_type=jnp.float32)

    @pl.when(j == pl.num_programs(0) - 1)
    def _epilogue():
        def bn_half(x):
            # Training-mode BatchNorm1d statistics over one branch's batch rows.
            mean = jnp.mean(x, axis=0, keepdims=True)
            var = jnp.mean((x - mean) ** 2, axis=0, keepdims=True)
            return (x - mean) * lax.rsqrt(var + EPS)

        def bn_pair(x, gamma=None, beta=None):
            # x is the stacked (2B, F) tensor; stats are computed independently
            # for each B-row half (sublane-aligned slices, B is a multiple of 8).
            xn = jnp.concatenate(
                [bn_half(x[:batch_size]), bn_half(x[batch_size:])], axis=0)
            if gamma is not None:
                xn = xn * gamma + beta
            return xn

        g0 = bn_ref[0:1, :]
        b0 = bn_ref[1:2, :]
        g1 = bn_ref[2:3, :]
        b1 = bn_ref[3:4, :]

        feat = feat_ref[...]                                            # (2B, Dp)
        h = jnp.dot(feat, w0_ref[...], preferred_element_type=jnp.float32)
        h = jnp.maximum(bn_pair(h, g0, b0), 0.0)
        h = jnp.dot(h, w1_ref[...], preferred_element_type=jnp.float32)
        h = jnp.maximum(bn_pair(h, g1, b1), 0.0)
        z = jnp.dot(h, w2_ref[...], preferred_element_type=jnp.float32)
        zbn = bn_pair(z)                                                # (2B, P)

        z1 = zbn[:batch_size]                                           # (B, P)
        z2 = zbn[batch_size:]                                           # (B, P)
        # c = z1.T @ z2 / batch_size without materializing an explicit transpose.
        c = lax.dot_general(z1, z2, (((0,), (0,)), ((), ())),
                            preferred_element_type=jnp.float32) / float(batch_size)

        p = c.shape[0]
        rows = lax.broadcasted_iota(jnp.int32, (p, p), 0)
        cols = lax.broadcasted_iota(jnp.int32, (p, p), 1)
        eye = (rows == cols).astype(jnp.float32)

        diag = jnp.sum(c * eye, axis=1, keepdims=True)                  # (P, 1)
        on_diag = jnp.sum((diag - 1.0) ** 2, keepdims=True)             # (1, 1)
        total_sq = jnp.sum(c * c, keepdims=True)                        # (1, 1)
        diag_sq = jnp.sum(diag * diag, keepdims=True)                   # (1, 1)
        loss_ref[...] = on_diag + float(lambd) * (total_sq - diag_sq)


def barlow_twins_loss(y1, y2, params, *, batch_size, lambd, tn=256):
    B = y1.shape[0]
    # Fuse the two branches into one (2B, D_in) operand; bf16 on the MXU side only.
    x = jnp.concatenate([y1.reshape(B, -1), y2.reshape(B, -1)], axis=0)
    x = x.astype(jnp.bfloat16)
    d_in = x.shape[1]

    wb, w0 = params["wb"], params["w0"]
    f0 = wb.shape[1]                         # 529 (ragged backbone feature dim)
    n_tiles = -(-f0 // tn)                   # ceil -> 3
    dp = n_tiles * tn                        # 768 = 3 * 256 (exact zero padding)
    wb_p = jnp.pad(wb.astype(jnp.float32), ((0, 0), (0, dp - f0))).astype(jnp.bfloat16)
    w0_p = jnp.pad(w0.astype(jnp.float32), ((0, dp - f0), (0, 0)))
    # Pack the 4 tiny BN affine params into a single input (fewer DMA descriptors).
    bn_p = jnp.concatenate([params["g0"], params["b0"],
                            params["g1"], params["b1"]], axis=0).astype(jnp.float32)
    w1 = params["w1"].astype(jnp.float32)
    w2 = params["w2"].astype(jnp.float32)
    h1, h2, p_dim = w0_p.shape[1], w1.shape[1], w2.shape[1]

    kernel = functools.partial(_barlow_kernel, batch_size=batch_size, lambd=lambd)

    out = pl.pallas_call(
        kernel,
        out_shape=jax.ShapeDtypeStruct((1, 1), jnp.float32),
        grid_spec=pltpu.PrefetchScalarGridSpec(
            num_scalar_prefetch=0,
            grid=(n_tiles,),
            in_specs=[
                pl.BlockSpec((2 * B, d_in), lambda j: (0, 0)),   # x (VMEM resident)
                pl.BlockSpec((d_in, tn), lambda j: (0, j)),      # wb column tile (pipelined)
                pl.BlockSpec((dp, h1), lambda j: (0, 0)),        # w0 (padded rows)
                pl.BlockSpec((4, h1), lambda j: (0, 0)),         # packed BN affine params
                pl.BlockSpec((h1, h2), lambda j: (0, 0)),        # w1
                pl.BlockSpec((h2, p_dim), lambda j: (0, 0)),     # w2
            ],
            out_specs=pl.BlockSpec((1, 1), lambda j: (0, 0)),
            scratch_shapes=[pltpu.VMEM((2 * B, dp), jnp.float32)],
        ),
        compiler_params=pltpu.CompilerParams(
            dimension_semantics=("arbitrary",)),
    )(x, wb_p, w0_p, bn_p, w1, w2)
    return out[0, 0]


def _reference_loss(y1, y2, params, *, batch_size, lambd, bf16_backbone):
    # Pure-JAX reference of the same forward pass (PyTorch semantics).
    B = y1.shape[0]

    def branch(y):
        x = y.reshape(B, -1).astype(jnp.float32)
        if bf16_backbone:
            feat = jnp.dot(x.astype(jnp.bfloat16),
                           params["wb"].astype(jnp.bfloat16),
                           preferred_element_type=jnp.float32)
        else:
            feat = x @ params["wb"]
        h = feat @ params["w0"]
        h = jnp.maximum(_bn_train(h, params["g0"], params["b0"]), 0.0)
        h = h @ params["w1"]
        h = jnp.maximum(_bn_train(h, params["g1"], params["b1"]), 0.0)
        z = h @ params["w2"]
        return _bn_train(z)

    c = branch(y1).T @ branch(y2) / batch_size
    d = jnp.diagonal(c)
    on = jnp.sum((d - 1.0) ** 2)
    off = jnp.sum(c ** 2) - jnp.sum(d ** 2)
    return on + lambd * off


def init_params(key, in_dim, sizes):
    # sizes = [529, 64, 64, 32] ; bias-free Linears + BN affine params (init 1/0)
    k = jax.random.split(key, 4)
    scale = lambda fan_in: 1.0 / jnp.sqrt(jnp.float32(fan_in))
    params = {
        "wb": jax.random.normal(k[0], (in_dim, sizes[0]), jnp.float32) * scale(in_dim),
        "w0": jax.random.normal(k[1], (sizes[0], sizes[1]), jnp.float32) * scale(sizes[0]),
        "g0": jnp.ones((1, sizes[1]), jnp.float32),
        "b0": jnp.zeros((1, sizes[1]), jnp.float32),
        "w1": jax.random.normal(k[2], (sizes[1], sizes[2]), jnp.float32) * scale(sizes[1]),
        "g1": jnp.ones((1, sizes[2]), jnp.float32),
        "b1": jnp.zeros((1, sizes[2]), jnp.float32),
        "w2": jax.random.normal(k[3], (sizes[2], sizes[3]), jnp.float32) * scale(sizes[2]),
    }
    return params


if __name__ == "__main__":
    B, C, H, W = 8, 4, 16, 16          # small NCHW inputs
    sizes = [529, 64, 64, 32]          # [backbone_dim] + projector "64-64-32"
    lambd = 0.005
    batch_size = B

    key = jax.random.PRNGKey(0)
    k_y1, k_y2, k_p = jax.random.split(key, 3)
    y1 = jax.random.normal(k_y1, (B, C, H, W), jnp.float32)
    y2 = jax.random.normal(k_y2, (B, C, H, W), jnp.float32)
    params = init_params(k_p, C * H * W, sizes)

    loss = barlow_twins_loss(y1, y2, params, batch_size=batch_size, lambd=lambd)
    loss = jax.block_until_ready(loss)

    # Reference with the same bf16-backbone precision choice (tight check) ...
    ref_bf16 = jax.block_until_ready(
        _reference_loss(y1, y2, params, batch_size=batch_size, lambd=lambd,
                        bf16_backbone=True))
    # ... and the full-f32 PyTorch-semantics reference (loose sanity check).
    ref_f32 = jax.block_until_ready(
        _reference_loss(y1, y2, params, batch_size=batch_size, lambd=lambd,
                        bf16_backbone=False))

    assert jnp.isfinite(loss)
    assert jnp.allclose(loss, ref_bf16, rtol=5e-3, atol=5e-3), (loss, ref_bf16)
    assert jnp.allclose(loss, ref_f32, rtol=1e-1, atol=1e-1), (loss, ref_f32)
    print("KERNEL_OK")
</pallas_src>

<mosaic_0001>
module attributes {stable_mosaic.version = 11 : i64} {
  func.func @_barlow_kernel(%arg0: i32, %arg1: memref<16x1024xbf16, #tpu.memory_space<vmem>>, %arg2: memref<1024x256xbf16, #tpu.memory_space<vmem>>, %arg3: memref<768x64xf32, #tpu.memory_space<vmem>>, %arg4: memref<4x64xf32, #tpu.memory_space<vmem>>, %arg5: memref<64x64xf32, #tpu.memory_space<vmem>>, %arg6: memref<64x32xf32, #tpu.memory_space<vmem>>, %arg7: memref<1x1xf32, #tpu.memory_space<vmem>>, %arg8: memref<16x768xf32, #tpu.memory_space<vmem>>) attributes {dimension_semantics = [#tpu.dimension_semantics<arbitrary>], iteration_bounds = array<i64: 3>, scalar_prefetch = 0 : i64, scratch_operands = 1 : i64, tpu.core_type = #tpu.core_type<tc>, window_params = [{pipeline_mode = #tpu.pipeline_mode<synchronous>, transform_indices = @transform_0, window_bounds = array<i64: 16, 1024>}, {transform_indices = @transform_1, window_bounds = array<i64: 1024, 256>}, {pipeline_mode = #tpu.pipeline_mode<synchronous>, transform_indices = @transform_2, window_bounds = array<i64: 768, 64>}, {pipeline_mode = #tpu.pipeline_mode<synchronous>, transform_indices = @transform_3, window_bounds = array<i64: 4, 64>}, {pipeline_mode = #tpu.pipeline_mode<synchronous>, transform_indices = @transform_4, window_bounds = array<i64: 64, 64>}, {pipeline_mode = #tpu.pipeline_mode<synchronous>, transform_indices = @transform_5, window_bounds = array<i64: 64, 32>}, {pipeline_mode = #tpu.pipeline_mode<synchronous>, transform_indices = @transform_6, window_bounds = array<i64: 1, 1>}]} {
    %c256_i32 = arith.constant 256 : i32
    %0 = arith.muli %arg0, %c256_i32 : i32
    %1 = tpu.assume_multiple %0, 256 : i32
    %c0 = arith.constant 0 : index
    %c0_0 = arith.constant 0 : index
    %2 = vector.load %arg1[%c0, %c0_0] : memref<16x1024xbf16, #tpu.memory_space<vmem>>, vector<16x1024xbf16>
    %c0_1 = arith.constant 0 : index
    %c0_2 = arith.constant 0 : index
    %3 = vector.load %arg2[%c0_1, %c0_2] : memref<1024x256xbf16, #tpu.memory_space<vmem>>, vector<1024x256xbf16>
    %cst = arith.constant dense<0.000000e+00> : vector<16x256xf32>
    %4 = tpu.matmul %2, %3, %cst {dimension_numbers = #tpu.dot_dimension_numbers<[1], [0], [0], [1], [0, 0, 1, 1], [], []>} : vector<16x1024xbf16>, vector<1024x256xbf16>, vector<16x256xf32> -> vector<16x256xf32>
    %c0_3 = arith.constant 0 : index
    %5 = arith.index_cast %1 : i32 to index
    %6 = vector.load %arg8[%c0_3, %5] : memref<16x768xf32, #tpu.memory_space<vmem>>, vector<16x256xf32>
    tpu.vector_store %arg8[%c0_3, %5], %4 {strides = array<i32>} : memref<16x768xf32, #tpu.memory_space<vmem>>, vector<16x256xf32>,
    %c2_i32 = arith.constant 2 : i32
    %7 = arith.cmpi eq, %arg0, %c2_i32 : i32
    %8 = arith.extui %7 : i1 to i32
    %c0_i32 = arith.constant 0 : i32
    %9 = arith.cmpi ne, %8, %c0_i32 : i32
    scf.if %9 {
      %c0_4 = arith.constant 0 : index
      %c0_5 = arith.constant 0 : index
      %10 = vector.load %arg4[%c0_4, %c0_5] : memref<4x64xf32, #tpu.memory_space<vmem>>, vector<1x64xf32>
      %c1 = arith.constant 1 : index
      %c0_6 = arith.constant 0 : index
      %11 = vector.load %arg4[%c1, %c0_6] : memref<4x64xf32, #tpu.memory_space<vmem>>, vector<1x64xf32>
      %c2 = arith.constant 2 : index
      %c0_7 = arith.constant 0 : index
      %12 = vector.load %arg4[%c2, %c0_7] : memref<4x64xf32, #tpu.memory_space<vmem>>, vector<1x64xf32>
      %c3 = arith.constant 3 : index
      %c0_8 = arith.constant 0 : index
      %13 = vector.load %arg4[%c3, %c0_8] : memref<4x64xf32, #tpu.memory_space<vmem>>, vector<1x64xf32>
      %c0_9 = arith.constant 0 : index
      %c0_10 = arith.constant 0 : index
      %14 = vector.load %arg8[%c0_9, %c0_10] : memref<16x768xf32, #tpu.memory_space<vmem>>, vector<16x768xf32>
      %c0_11 = arith.constant 0 : index
      %c0_12 = arith.constant 0 : index
      %15 = vector.load %arg3[%c0_11, %c0_12] : memref<768x64xf32, #tpu.memory_space<vmem>>, vector<768x64xf32>
      %cst_13 = arith.constant dense<0.000000e+00> : vector<16x64xf32>
      %16 = tpu.matmul %14, %15, %cst_13 {dimension_numbers = #tpu.dot_dimension_numbers<[1], [0], [0], [1], [0, 0, 1, 1], [], []>} : vector<16x768xf32>, vector<768x64xf32>, vector<16x64xf32> -> vector<16x64xf32>
      %17 = vector.extract_strided_slice %16 {offsets = [0, 0], sizes = [8, 64], strides = [1, 1]} : vector<16x64xf32> to vector<8x64xf32>
      %cst_14 = arith.constant dense<0.000000e+00> : vector<64xf32>
      %18 = vector.multi_reduction <add>, %17, %cst_14 [0] : vector<8x64xf32> to vector<64xf32>
      %19 = vector.shape_cast %18 : vector<64xf32> to vector<1x64xf32>
      %cst_15 = arith.constant 8.000000e+00 : f32
      %20 = vector.broadcast %cst_15 : f32 to vector<1x64xf32>
      %21 = arith.divf %19, %20 : vector<1x64xf32>
      %22 = vector.broadcast %21 : vector<1x64xf32> to vector<8x64xf32>
      %23 = arith.subf %17, %22 : vector<8x64xf32>
      %24 = arith.mulf %23, %23 : vector<8x64xf32>
      %cst_16 = arith.constant dense<0.000000e+00> : vector<64xf32>
      %25 = vector.multi_reduction <add>, %24, %cst_16 [0] : vector<8x64xf32> to vector<64xf32>
      %26 = vector.shape_cast %25 : vector<64xf32> to vector<1x64xf32>
      %cst_17 = arith.constant 8.000000e+00 : f32
      %27 = vector.broadcast %cst_17 : f32 to vector<1x64xf32>
      %28 = arith.divf %26, %27 : vector<1x64xf32>
      %29 = vector.broadcast %21 : vector<1x64xf32> to vector<8x64xf32>
      %30 = arith.subf %17, %29 : vector<8x64xf32>
      %cst_18 = arith.constant 9.99999974E-6 : f32
      %31 = vector.broadcast %cst_18 : f32 to vector<1x64xf32>
      %32 = arith.addf %28, %31 : vector<1x64xf32>
      %33 = math.rsqrt %32 : vector<1x64xf32>
      %34 = vector.broadcast %33 : vector<1x64xf32> to vector<8x64xf32>
      %35 = arith.mulf %30, %34 : vector<8x64xf32>
      %36 = vector.extract_strided_slice %16 {offsets = [8, 0], sizes = [8, 64], strides = [1, 1]} : vector<16x64xf32> to vector<8x64xf32>
      %cst_19 = arith.constant dense<0.000000e+00> : vector<64xf32>
      %37 = vector.multi_reduction <add>, %36, %cst_19 [0] : vector<8x64xf32> to vector<64xf32>
      %38 = vector.shape_cast %37 : vector<64xf32> to vector<1x64xf32>
      %cst_20 = arith.constant 8.000000e+00 : f32
      %39 = vector.broadcast %cst_20 : f32 to vector<1x64xf32>
      %40 = arith.divf %38, %39 : vector<1x64xf32>
      %41 = vector.broadcast %40 : vector<1x64xf32> to vector<8x64xf32>
      %42 = arith.subf %36, %41 : vector<8x64xf32>
      %43 = arith.mulf %42, %42 : vector<8x64xf32>
      %cst_21 = arith.constant dense<0.000000e+00> : vector<64xf32>
      %44 = vector.multi_reduction <add>, %43, %cst_21 [0] : vector<8x64xf32> to vector<64xf32>
      %45 = vector.shape_cast %44 : vector<64xf32> to vector<1x64xf32>
      %cst_22 = arith.constant 8.000000e+00 : f32
      %46 = vector.broadcast %cst_22 : f32 to vector<1x64xf32>
      %47 = arith.divf %45, %46 : vector<1x64xf32>
      %48 = vector.broadcast %40 : vector<1x64xf32> to vector<8x64xf32>
      %49 = arith.subf %36, %48 : vector<8x64xf32>
      %cst_23 = arith.constant 9.99999974E-6 : f32
      %50 = vector.broadcast %cst_23 : f32 to vector<1x64xf32>
      %51 = arith.addf %47, %50 : vector<1x64xf32>
      %52 = math.rsqrt %51 : vector<1x64xf32>
      %53 = vector.broadcast %52 : vector<1x64xf32> to vector<8x64xf32>
      %54 = arith.mulf %49, %53 : vector<8x64xf32>
      %55 = tpu.concatenate %35, %54 in 0 : vector<8x64xf32>, vector<8x64xf32> -> vector<16x64xf32>
      %56 = vector.broadcast %10 : vector<1x64xf32> to vector<16x64xf32>
      %57 = arith.mulf %55, %56 : vector<16x64xf32>
      %58 = vector.broadcast %11 : vector<1x64xf32> to vector<16x64xf32>
      %59 = arith.addf %57, %58 : vector<16x64xf32>
      %cst_24 = arith.constant 0.000000e+00 : f32
      %60 = vector.broadcast %cst_24 : f32 to vector<16x64xf32>
      %61 = arith.maximumf %59, %60 : vector<16x64xf32>
      %c0_25 = arith.constant 0 : index
      %c0_26 = arith.constant 0 : index
      %62 = vector.load %arg5[%c0_25, %c0_26] : memref<64x64xf32, #tpu.memory_space<vmem>>, vector<64x64xf32>
      %cst_27 = arith.constant dense<0.000000e+00> : vector<16x64xf32>
      %63 = tpu.matmul %61, %62, %cst_27 {dimension_numbers = #tpu.dot_dimension_numbers<[1], [0], [0], [1], [0, 0, 1, 1], [], []>} : vector<16x64xf32>, vector<64x64xf32>, vector<16x64xf32> -> vector<16x64xf32>
      %64 = vector.extract_strided_slice %63 {offsets = [0, 0], sizes = [8, 64], strides = [1, 1]} : vector<16x64xf32> to vector<8x64xf32>
      %cst_28 = arith.constant dense<0.000000e+00> : vector<64xf32>
      %65 = vector.multi_reduction <add>, %64, %cst_28 [0] : vector<8x64xf32> to vector<64xf32>
      %66 = vector.shape_cast %65 : vector<64xf32> to vector<1x64xf32>
      %cst_29 = arith.constant 8.000000e+00 : f32
      %67 = vector.broadcast %cst_29 : f32 to vector<1x64xf32>
      %68 = arith.divf %66, %67 : vector<1x64xf32>
      %69 = vector.broadcast %68 : vector<1x64xf32> to vector<8x64xf32>
      %70 = arith.subf %64, %69 : vector<8x64xf32>
      %71 = arith.mulf %70, %70 : vector<8x64xf32>
      %cst_30 = arith.constant dense<0.000000e+00> : vector<64xf32>
      %72 = vector.multi_reduction <add>, %71, %cst_30 [0] : vector<8x64xf32> to vector<64xf32>
      %73 = vector.shape_cast %72 : vector<64xf32> to vector<1x64xf32>
      %cst_31 = arith.constant 8.000000e+00 : f32
      %74 = vector.broadcast %cst_31 : f32 to vector<1x64xf32>
      %75 = arith.divf %73, %74 : vector<1x64xf32>
      %76 = vector.broadcast %68 : vector<1x64xf32> to vector<8x64xf32>
      %77 = arith.subf %64, %76 : vector<8x64xf32>
      %cst_32 = arith.constant 9.99999974E-6 : f32
      %78 = vector.broadcast %cst_32 : f32 to vector<1x64xf32>
      %79 = arith.addf %75, %78 : vector<1x64xf32>
      %80 = math.rsqrt %79 : vector<1x64xf32>
      %81 = vector.broadcast %80 : vector<1x64xf32> to vector<8x64xf32>
      %82 = arith.mulf %77, %81 : vector<8x64xf32>
      %83 = vector.extract_strided_slice %63 {offsets = [8, 0], sizes = [8, 64], strides = [1, 1]} : vector<16x64xf32> to vector<8x64xf32>
      %cst_33 = arith.constant dense<0.000000e+00> : vector<64xf32>
      %84 = vector.multi_reduction <add>, %83, %cst_33 [0] : vector<8x64xf32> to vector<64xf32>
      %85 = vector.shape_cast %84 : vector<64xf32> to vector<1x64xf32>
      %cst_34 = arith.constant 8.000000e+00 : f32
      %86 = vector.broadcast %cst_34 : f32 to vector<1x64xf32>
      %87 = arith.divf %85, %86 : vector<1x64xf32>
      %88 = vector.broadcast %87 : vector<1x64xf32> to vector<8x64xf32>
      %89 = arith.subf %83, %88 : vector<8x64xf32>
      %90 = arith.mulf %89, %89 : vector<8x64xf32>
      %cst_35 = arith.constant dense<0.000000e+00> : vector<64xf32>
      %91 = vector.multi_reduction <add>, %90, %cst_35 [0] : vector<8x64xf32> to vector<64xf32>
      %92 = vector.shape_cast %91 : vector<64xf32> to vector<1x64xf32>
      %cst_36 = arith.constant 8.000000e+00 : f32
      %93 = vector.broadcast %cst_36 : f32 to vector<1x64xf32>
      %94 = arith.divf %92, %93 : vector<1x64xf32>
      %95 = vector.broadcast %87 : vector<1x64xf32> to vector<8x64xf32>
      %96 = arith.subf %83, %95 : vector<8x64xf32>
      %cst_37 = arith.constant 9.99999974E-6 : f32
      %97 = vector.broadcast %cst_37 : f32 to vector<1x64xf32>
      %98 = arith.addf %94, %97 : vector<1x64xf32>
      %99 = math.rsqrt %98 : vector<1x64xf32>
      %100 = vector.broadcast %99 : vector<1x64xf32> to vector<8x64xf32>
      %101 = arith.mulf %96, %100 : vector<8x64xf32>
      %102 = tpu.concatenate %82, %101 in 0 : vector<8x64xf32>, vector<8x64xf32> -> vector<16x64xf32>
      %103 = vector.broadcast %12 : vector<1x64xf32> to vector<16x64xf32>
      %104 = arith.mulf %102, %103 : vector<16x64xf32>
      %105 = vector.broadcast %13 : vector<1x64xf32> to vector<16x64xf32>
      %106 = arith.addf %104, %105 : vector<16x64xf32>
      %cst_38 = arith.constant 0.000000e+00 : f32
      %107 = vector.broadcast %cst_38 : f32 to vector<16x64xf32>
      %108 = arith.maximumf %106, %107 : vector<16x64xf32>
      %c0_39 = arith.constant 0 : index
      %c0_40 = arith.constant 0 : index
      %109 = vector.load %arg6[%c0_39, %c0_40] : memref<64x32xf32, #tpu.memory_space<vmem>>, vector<64x32xf32>
      %cst_41 = arith.constant dense<0.000000e+00> : vector<16x32xf32>
      %110 = tpu.matmul %108, %109, %cst_41 {dimension_numbers = #tpu.dot_dimension_numbers<[1], [0], [0], [1], [0, 0, 1, 1], [], []>} : vector<16x64xf32>, vector<64x32xf32>, vector<16x32xf32> -> vector<16x32xf32>
      %111 = vector.extract_strided_slice %110 {offsets = [0, 0], sizes = [8, 32], strides = [1, 1]} : vector<16x32xf32> to vector<8x32xf32>
      %cst_42 = arith.constant dense<0.000000e+00> : vector<32xf32>
      %112 = vector.multi_reduction <add>, %111, %cst_42 [0] : vector<8x32xf32> to vector<32xf32>
      %113 = vector.shape_cast %112 : vector<32xf32> to vector<1x32xf32>
      %cst_43 = arith.constant 8.000000e+00 : f32
      %114 = vector.broadcast %cst_43 : f32 to vector<1x32xf32>
      %115 = arith.divf %113, %114 : vector<1x32xf32>
      %116 = vector.broadcast %115 : vector<1x32xf32> to vector<8x32xf32>
      %117 = arith.subf %111, %116 : vector<8x32xf32>
      %118 = arith.mulf %117, %117 : vector<8x32xf32>
      %cst_44 = arith.constant dense<0.000000e+00> : vector<32xf32>
      %119 = vector.multi_reduction <add>, %118, %cst_44 [0] : vector<8x32xf32> to vector<32xf32>
      %120 = vector.shape_cast %119 : vector<32xf32> to vector<1x32xf32>
      %cst_45 = arith.constant 8.000000e+00 : f32
      %121 = vector.broadcast %cst_45 : f32 to vector<1x32xf32>
      %122 = arith.divf %120, %121 : vector<1x32xf32>
      %123 = vector.broadcast %115 : vector<1x32xf32> to vector<8x32xf32>
      %124 = arith.subf %111, %123 : vector<8x32xf32>
      %cst_46 = arith.constant 9.99999974E-6 : f32
      %125 = vector.broadcast %cst_46 : f32 to vector<1x32xf32>
      %126 = arith.addf %122, %125 : vector<1x32xf32>
      %127 = math.rsqrt %126 : vector<1x32xf32>
      %128 = vector.broadcast %127 : vector<1x32xf32> to vector<8x32xf32>
      %129 = arith.mulf %124, %128 : vector<8x32xf32>
      %130 = vector.extract_strided_slice %110 {offsets = [8, 0], sizes = [8, 32], strides = [1, 1]} : vector<16x32xf32> to vector<8x32xf32>
      %cst_47 = arith.constant dense<0.000000e+00> : vector<32xf32>
      %131 = vector.multi_reduction <add>, %130, %cst_47 [0] : vector<8x32xf32> to vector<32xf32>
      %132 = vector.shape_cast %131 : vector<32xf32> to vector<1x32xf32>
      %cst_48 = arith.constant 8.000000e+00 : f32
      %133 = vector.broadcast %cst_48 : f32 to vector<1x32xf32>
      %134 = arith.divf %132, %133 : vector<1x32xf32>
      %135 = vector.broadcast %134 : vector<1x32xf32> to vector<8x32xf32>
      %136 = arith.subf %130, %135 : vector<8x32xf32>
      %137 = arith.mulf %136, %136 : vector<8x32xf32>
      %cst_49 = arith.constant dense<0.000000e+00> : vector<32xf32>
      %138 = vector.multi_reduction <add>, %137, %cst_49 [0] : vector<8x32xf32> to vector<32xf32>
      %139 = vector.shape_cast %138 : vector<32xf32> to vector<1x32xf32>
      %cst_50 = arith.constant 8.000000e+00 : f32
      %140 = vector.broadcast %cst_50 : f32 to vector<1x32xf32>
      %141 = arith.divf %139, %140 : vector<1x32xf32>
      %142 = vector.broadcast %134 : vector<1x32xf32> to vector<8x32xf32>
      %143 = arith.subf %130, %142 : vector<8x32xf32>
      %cst_51 = arith.constant 9.99999974E-6 : f32
      %144 = vector.broadcast %cst_51 : f32 to vector<1x32xf32>
      %145 = arith.addf %141, %144 : vector<1x32xf32>
      %146 = math.rsqrt %145 : vector<1x32xf32>
      %147 = vector.broadcast %146 : vector<1x32xf32> to vector<8x32xf32>
      %148 = arith.mulf %143, %147 : vector<8x32xf32>
      %149 = tpu.concatenate %129, %148 in 0 : vector<8x32xf32>, vector<8x32xf32> -> vector<16x32xf32>
      %150 = vector.extract_strided_slice %149 {offsets = [0, 0], sizes = [8, 32], strides = [1, 1]} : vector<16x32xf32> to vector<8x32xf32>
      %151 = vector.extract_strided_slice %149 {offsets = [8, 0], sizes = [8, 32], strides = [1, 1]} : vector<16x32xf32> to vector<8x32xf32>
      %cst_52 = arith.constant dense<0.000000e+00> : vector<32x32xf32>
      %152 = tpu.matmul %150, %151, %cst_52 {dimension_numbers = #tpu.dot_dimension_numbers<[0], [0], [1], [1], [0, 1, 1, 1], [], []>} : vector<8x32xf32>, vector<8x32xf32>, vector<32x32xf32> -> vector<32x32xf32>
      %cst_53 = arith.constant 8.000000e+00 : f32
      %153 = vector.broadcast %cst_53 : f32 to vector<32x32xf32>
      %154 = arith.divf %152, %153 : vector<32x32xf32>
      %155 = tpu.iota {dimensions = array<i32: 0>} : vector<32x32xi32>
      %156 = tpu.iota {dimensions = array<i32: 1>} : vector<32x32xi32>
      %157 = arith.cmpi eq, %155, %156 : vector<32x32xi32>
      %158 = arith.extui %157 : vector<32x32xi1> to vector<32x32xi32>
      %159 = arith.sitofp %158 : vector<32x32xi32> to vector<32x32xf32>
      %160 = arith.mulf %154, %159 : vector<32x32xf32>
      %cst_54 = arith.constant dense<0.000000e+00> : vector<32xf32>
      %161 = vector.multi_reduction <add>, %160, %cst_54 [1] : vector<32x32xf32> to vector<32xf32>
      %162 = vector.shape_cast %161 : vector<32xf32> to vector<32x1xf32>
      %cst_55 = arith.constant 1.000000e+00 : f32
      %163 = vector.broadcast %cst_55 : f32 to vector<32x1xf32>
      %164 = arith.subf %162, %163 : vector<32x1xf32>
      %165 = arith.mulf %164, %164 : vector<32x1xf32>
      %166 = vector.shape_cast %165 : vector<32x1xf32> to vector<1x32x1xf32>
      %cst_56 = arith.constant dense<0.000000e+00> : vector<1xf32>
      %167 = vector.multi_reduction <add>, %166, %cst_56 [1, 2] : vector<1x32x1xf32> to vector<1xf32>
      %168 = vector.shape_cast %167 : vector<1xf32> to vector<1x1x1xf32>
      %169 = vector.extract %168[0, 0, 0] : f32 from vector<1x1x1xf32>
      %170 = vector.broadcast %169 : f32 to vector<1x1xf32>
      %171 = arith.mulf %154, %154 : vector<32x32xf32>
      %172 = vector.shape_cast %171 : vector<32x32xf32> to vector<1x32x32xf32>
      %cst_57 = arith.constant dense<0.000000e+00> : vector<1xf32>
      %173 = vector.multi_reduction <add>, %172, %cst_57 [1, 2] : vector<1x32x32xf32> to vector<1xf32>
      %174 = vector.shape_cast %173 : vector<1xf32> to vector<1x1x1xf32>
      %175 = vector.extract %174[0, 0, 0] : f32 from vector<1x1x1xf32>
      %176 = vector.broadcast %175 : f32 to vector<1x1xf32>
      %177 = arith.mulf %162, %162 : vector<32x1xf32>
      %178 = vector.shape_cast %177 : vector<32x1xf32> to vector<1x32x1xf32>
      %cst_58 = arith.constant dense<0.000000e+00> : vector<1xf32>
      %179 = vector.multi_reduction <add>, %178, %cst_58 [1, 2] : vector<1x32x1xf32> to vector<1xf32>
      %180 = vector.shape_cast %179 : vector<1xf32> to vector<1x1x1xf32>
      %181 = vector.extract %180[0, 0, 0] : f32 from vector<1x1x1xf32>
      %182 = vector.broadcast %181 : f32 to vector<1x1xf32>
      %183 = arith.subf %176, %182 : vector<1x1xf32>
      %cst_59 = arith.constant 5.000000e-03 : f32
      %184 = vector.broadcast %cst_59 : f32 to vector<1x1xf32>
      %185 = arith.mulf %184, %183 : vector<1x1xf32>
      %186 = arith.addf %170, %185 : vector<1x1xf32>
      %c0_60 = arith.constant 0 : index
      %c0_61 = arith.constant 0 : index
      %187 = vector.load %arg7[%c0_60, %c0_61] : memref<1x1xf32, #tpu.memory_space<vmem>>, vector<1x1xf32>
      tpu.vector_store %arg7[%c0_60, %c0_61], %186 {strides = array<i32>} : memref<1x1xf32, #tpu.memory_space<vmem>>, vector<1x1xf32>,
    } else {
    }
    return
  }
  func.func @transform_0(%arg0: i32) -> (i32, i32) {
    %c0_i32 = arith.constant 0 : i32
    %c0_i32_0 = arith.constant 0 : i32
    %c0_i32_1 = arith.constant 0 : i32
    return %c0_i32, %c0_i32_0 : i32, i32
  }
  func.func @transform_1(%arg0: i32) -> (i32, i32) {
    %c0_i32 = arith.constant 0 : i32
    %c0_i32_0 = arith.constant 0 : i32
    return %c0_i32, %arg0 : i32, i32
  }
  func.func @transform_2(%arg0: i32) -> (i32, i32) {
    %c0_i32 = arith.constant 0 : i32
    %c0_i32_0 = arith.constant 0 : i32
    %c0_i32_1 = arith.constant 0 : i32
    return %c0_i32, %c0_i32_0 : i32, i32
  }
  func.func @transform_3(%arg0: i32) -> (i32, i32) {
    %c0_i32 = arith.constant 0 : i32
    %c0_i32_0 = arith.constant 0 : i32
    %c0_i32_1 = arith.constant 0 : i32
    return %c0_i32, %c0_i32_0 : i32, i32
  }
  func.func @transform_4(%arg0: i32) -> (i32, i32) {
    %c0_i32 = arith.constant 0 : i32
    %c0_i32_0 = arith.constant 0 : i32
    %c0_i32_1 = arith.constant 0 : i32
    return %c0_i32, %c0_i32_0 : i32, i32
  }
  func.func @transform_5(%arg0: i32) -> (i32, i32) {
    %c0_i32 = arith.constant 0 : i32
    %c0_i32_0 = arith.constant 0 : i32
    %c0_i32_1 = arith.constant 0 : i32
    return %c0_i32, %c0_i32_0 : i32, i32
  }
  func.func @transform_6(%arg0: i32) -> (i32, i32) {
    %c0_i32 = arith.constant 0 : i32
    %c0_i32_0 = arith.constant 0 : i32
    %c0_i32_1 = arith.constant 0 : i32
    return %c0_i32, %c0_i32_0 : i32, i32
  }
}

</mosaic_0001>

<bundles_post_ra>
// kernel: tpu_custom_call.1
= control target key start
LH: loop header
LB: loop body
LE: loop exit
PB: predicated region body
PF: predicated region fallthrough
CT: control target
= control target key end

     0   :  { %s4040_s0 = inlined_call_operand.hbm [shape: bf16[16,1024], index: 0, kind: input, shape index: {}]   ;;  %s4041_s1 = inlined_call_operand.hbm [shape: bf16[1024,768], index: 1, kind: input, shape index: {}]   ;;  %s4042_s2 = inlined_call_operand.vmem [shape: f32[768,64], index: 2, kind: input, shape index: {}]   ;;  %s4043_s3 = inlined_call_operand.hbm [shape: f32[4,64], index: 3, kind: input, shape index: {}]   ;;  %s4044_s4 = inlined_call_operand.hbm [shape: f32[64,64], index: 4, kind: input, shape index: {}]   ;;  %s4045_s5 = inlined_call_operand.vmem [shape: f32[64,32], index: 5, kind: input, shape index: {}]   ;;  %s4046_s6 = inlined_call_operand.hbm [shape: f32[1,1], index: 6, kind: output, shape index: {}]  }
   0x1   :  { %4047 = sst [smem:[#allocation17_spill]] %s4040_s0 }
   0x2   :  { %4048 = sst [smem:[#allocation18_spill]] %s4043_s3 }
   0x3   :  { %11 = vsyncpa [#allocation4], 0 }
   0x4   :  { %12 = vsyncpa [#allocation7], 0 }
   0x5   :  { %14 = vsyncpa [#allocation7 + $0x1], 0 }
   0x6   :  { %15 = vsyncpa [#allocation10], 0 }
   0x7   :  { %16 = vsyncpa [#allocation5], 0  ;;  %s3241_s21 = smov 0   ;;  %s3243_s22 = smov 0  }
   0x8   :  { %s3245_s23 = smov 0   ;;  %s3247_s24 = smov 0  }
   0x9 LB: > { %s3260_s25 = sadd.s32 4294967295, %s3193_s24   ;;  %s3263_s26 = sadd.s32 1, %s3193_s24   ;;  %s3193_s24 = sphi %s3247_s24, %s4059_s24   ;;  %s3189_s23 = sphi %s3245_s23, %s4058_s23   ;;  %s3185_s22 = sphi %s3243_s22, %s4057_s22   ;;  %s3181_s21 = sphi %s3241_s21, %s4056_s21  }
   0xa   : > { %s47_s27 = ssub.s32 %s3193_s24, %s3263_s26  ;;  %s50_s28 = sadd.s32 1, %s3189_s23 }
   0xb   : > { %p48_p0 = scmp.eq.s32.totalorder %s47_s27, 0  ;;  %p57_p1 = scmp.ne.s32.totalorder %s3189_s23, %s3185_s22 }
   0xc   : > { %p58_p2 = scmp.eq.s32.totalorder %s3193_s24, 0  ;;  %p63_p3 = scmp.ne.s32.totalorder %s3185_s22, %s3181_s21 }
   0xd   : > { %s3273_s29 = scalar_select %p48_p0, %s3189_s23, %s50_s28  }
   0xe   : > { %p3275_p4 = por %p58_p2, %p57_p1  ;;  %p64_p5 = scmp.eq.s32.totalorder %s3260_s25, 0 }
   0xf   : > { %p2170_p6 = scmp.ge.s32.totalorder %s3193_s24, 1  ;;  %p179_p7 = scmp.lt.s32.totalorder %s3193_s24, 4 }
  0x10   : > { %p3284_p8 = por %p64_p5, %p63_p3  ;;  %s4052_s3 = sld [smem:[#allocation18_spill]] }
  0x11   : > { %p3288_p9 = pnand %p2170_p6, %p179_p7  ;;  %s3195_s12 = smov [#allocation8]  }
  0x12   : > { %s210_s13 = sshll.u32 %s3195_s12, 4  ;;  %p2928_p12 = scmp.lt.s32.totalorder %s3193_s24, 3  ;;  %s211_s13 = int_to_ptr.vmem [resolvable:$true] %s210_s13 }
  0x13   : > { %p2911_p10 = pneg %p3288_p9  ;;  %s4054_s0 = sld [smem:[#allocation17_spill]] }
  0x14   : > { %p3309_p13 = pnand %p2928_p12, %p3275_p4  ;;  %s3196_s19 = smov [#allocation3]  }
  0x15   : > { %p3299_p11 = pnand %p2911_p10, %p64_p5  ;;  %s192_s20 = sshll.u32 %s3196_s19, 4  ;;  %s193_s20 = int_to_ptr.vmem [resolvable:$true] %s192_s20 }
  0x16   : > { %s208_s11 = sshll.u32 %s4052_s3, 4  ;;  %s3197_s21 = smov 512   ;;  %s209_s11 = int_to_ptr.hbm [resolvable:$true] %s208_s11 }
  0x17   : > { %2917 = dma.hbm_to_vmem [thread:$0]  (!%p3299_p11), %s209_s11, 64, %s211_s13, [#allocation7]  }
  0x18   : > { %s3198_s27 = smov 32   ;;  %s219_s30 = sshll.u32 %s4044_s4, 4  ;;  %s220_s30 = int_to_ptr.hbm [resolvable:$true] %s219_s30 }
  0x19   : > { %s190_s17 = sshll.u32 %s4054_s0, 4  ;;  %s3199_s10 = smov [#allocation9]   ;;  %s191_s17 = int_to_ptr.hbm [resolvable:$true] %s190_s17 }
  0x1a   : > { %2914 = dma.hbm_to_vmem [thread:$0]  (!%p3299_p11), %s191_s17, 1024, %s193_s20, [#allocation4], %s3197_s21, %s3197_s21, %s3198_s27  }
  0x1b   : > { %s221_s12 = sshll.u32 %s3199_s10, 4  ;;  %s238_s11 = sand.u32 1, %s3193_s24   ;;  %s222_s12 = int_to_ptr.vmem [resolvable:$true] %s221_s12 }
  0x1c   : > { %s3200_s13 = smov 128   ;;  %s3201_s15 = smov 8  }
  0x1d   : > { %2920 = dma.hbm_to_vmem [thread:$0]  (!%p3299_p11), %s220_s30, 1024, %s222_s12, [#allocation10], %s3200_s13, %s3200_s13, %s3201_s15  }
  0x1e   : > { %s240_s16 = sand.u32 1, %s3189_s23   ;;  %s2750_s17 = sshll.u32 %s3193_s24, 3 }
  0x1f   : > { %s2175_s19 = sshll.u32 %s240_s16, 10  ;;  %s247_s27 = scalar_lea.hbm %s4041_s1, %s2750_s17 }
  0x20   : > { %s248_s28 = sshll.u32 %s247_s27, 4  ;;  %s242_s9 = scalar_lea.vmem [#allocation6], %s2175_s19  ;;  %s249_s28 = int_to_ptr.hbm [resolvable:$true] %s248_s28 }
  0x21   : > { %s250_s10 = sshll.u32 %s242_s9, 4  ;;  %s239_s0 = scalar_lea.sflag [#allocation7], %s238_s11  ;;  %s251_s10 = int_to_ptr.vmem [resolvable:$true] %s250_s10 }
  0x22   : > { %s3085_s3 = sshra.s32 %s249_s28, 4  ;;  %p3089_p1 = pneg %p3309_p13  ;;  %s3086_s3 = int_to_ptr.hbm [resolvable:$true] %s3085_s3 }
  0x23   : > { %s3087_s14 = scalar_lea.hbm %s3086_s3, 1024  ;;  %s3092_s12 = scalar_lea.hbm %s4041_s1, 3072 }
  0x24   : > { %p3088_p0 = scmp.ne.s32.totalorder %s3086_s3, %s3087_s14  ;;  %p3093_p4 = scmp.lt.s32.totalorder %s3086_s3, %s4041_s1 }
  0x25   : > { %p3094_p6 = scmp.lt.s32.totalorder %s3092_s12, %s3087_s14 }
  0x26   : > { %p3090_p2 = pnand %p3089_p1, %p3088_p0 }
  0x27   : > { %p3095_p7 = por %p3094_p6, %p3093_p4 }
  0x28   : > { %p3091_p3 = pneg %p3090_p2 }
  0x2a   : > { %p3096_p10 = pnand %p3095_p7, %p3091_p3 }
  0x2c   : > { %3099 = shalt.err (!%p3096_p10)
}
  0x2d   : > { %s3202_s11 = smov 384   ;;  %262 = sbr.rel (%p3288_p9) target bundleno = 1622 (0x656), region = 44 }
  0x2e   : > { %2924 = dma.hbm_to_vmem [thread:$0]  (!%p3309_p13), %s249_s28, 16384, %s251_s10, %s239_s0, %s3202_s11, %s3200_s13, %s3201_s15  }
  0x32   : > { %3160 = dma.done.wait (%p64_p5), [#allocation4], 1024  }
  0x33   : > { %3162 = vsyncadd (%p64_p5), [#allocation4], 4294966272  ;;  %s269_s3 = sand.u32 1, %s3260_s25   ;;  %s271_s19 = sand.u32 1, %s3185_s22  }
  0x34   : > { %s2180_s20 = sshll.u32 %s271_s19, 10  ;;  %s270_s21 = scalar_lea.sflag [#allocation7], %s269_s3 }
  0x35   : > { %s3351_s18 = scalar_lea.vmem [#allocation6], %s2180_s20 }
  0x36   : > { %3164 = dma.done.wait (%p3284_p8), %s270_s21, 16384  }
  0x37   : > { %3166 = vsyncadd (%p3284_p8), %s270_s21, 4294950912 }
  0x38   : > { %3168 = dma.done.wait (%p64_p5), [#allocation7], 64  }
  0x39   : > { %3170 = vsyncadd (%p64_p5), [#allocation7], 4294967232 }
  0x3a   : > { %3172 = dma.done.wait (%p64_p5), [#allocation10], 1024  }
  0x3b   : > { %3174 = vsyncadd (%p64_p5), [#allocation10], 4294966272  ;;  %v2274_v0 = vld [vmem:[%s3351_s18 + $0x70] sm:$0xf]  ;;  %v2774_v1 = vld [vmem:[%s3351_s18 + $0x74] sm:$0xf0] }
  0x3c   : > { %v2338_v2 = vld [vmem:[%s3351_s18 + $0xf0] sm:$0xf]  ;;  %v2275_v3 = vor.u32 %v2774_v1, %v2274_v0  ;;  %v2790_v4 = vld [vmem:[%s3351_s18 + $0xf4] sm:$0xf0]  ;;  %v2266_v11 = vld [vmem:[%s3351_s18 + $0x60] sm:$0xf] }
  0x3d   : > { %v2402_v5 = vld [vmem:[%s3351_s18 + $0x170] sm:$0xf]  ;;  %v2806_v6 = vld [vmem:[%s3351_s18 + $0x174] sm:$0xf0]  ;;  %v2339_v7 = vor.u32 %v2790_v4, %v2338_v2  ;;  %v2772_v13 = vld [vmem:[%s3351_s18 + $0x64] sm:$0xf0] }
  0x3e   : > { %v2403_v8 = vor.u32 %v2806_v6, %v2402_v5  ;;  %v2466_v9 = vld [vmem:[%s3351_s18 + $0x1f0] sm:$0xf]  ;;  %v2822_v10 = vld [vmem:[%s3351_s18 + $0x1f4] sm:$0xf0]  ;;  %1126 = vmatpush.bf16.msra.mxu0 %v2275_v3  ;;  %v2330_v14 = vld [vmem:[%s3351_s18 + $0xe0] sm:$0xf]  ;;  %v2267_v16 = vor.u32 %v2772_v13, %v2266_v11 }
  0x3f   : > { %v2467_v12 = vor.u32 %v2822_v10, %v2466_v9  ;;  %v2788_v15 = vld [vmem:[%s3351_s18 + $0xe4] sm:$0xf0]  ;;  %1140 = vmatpush.bf16.msra.mxu1 %v2339_v7  ;;  %v2394_v18 = vld [vmem:[%s3351_s18 + $0x160] sm:$0xf]  ;;  %v2258_v23 = vld [vmem:[%s3351_s18 + $0x50] sm:$0xf] }
  0x40   : > { %1154 = vmatpush.bf16.msra.mxu2 %v2403_v8  ;;  %v2331_v17 = vor.u32 %v2788_v15, %v2330_v14  ;;  %v2804_v19 = vld [vmem:[%s3351_s18 + $0x164] sm:$0xf0]  ;;  %v2458_v20 = vld [vmem:[%s3351_s18 + $0x1e0] sm:$0xf]  ;;  %v2770_v24 = vld [vmem:[%s3351_s18 + $0x54] sm:$0xf0] }
  0x41   : > { %1168 = vmatpush.bf16.msra.mxu3 %v2467_v12  ;;  %v2395_v21 = vor.u32 %v2804_v19, %v2394_v18  ;;  %v2820_v22 = vld [vmem:[%s3351_s18 + $0x1e4] sm:$0xf0]  ;;  %v2322_v26 = vld [vmem:[%s3351_s18 + $0xd0] sm:$0xf]  ;;  %v2786_v27 = vld [vmem:[%s3351_s18 + $0xd4] sm:$0xf0]  ;;  %v2259_v29 = vor.u32 %v2770_v24, %v2258_v23 }
  0x42   : > { %v2459_v25 = vor.u32 %v2820_v22, %v2458_v20  ;;  %v2386_v28 = vld [vmem:[%s3351_s18 + $0x150] sm:$0xf]  ;;  %1127 = vmatpush.bf16.msra.mxu0 %v2267_v16  ;;  %v2802_v30 = vld [vmem:[%s3351_s18 + $0x154] sm:$0xf0]  ;;  %v2323_v33 = vor.u32 %v2786_v27, %v2322_v26  ;;  %v2250_v35 = vld [vmem:[%s3351_s18 + $0x40] sm:$0xf] }
  0x43   : > { %v2450_v31 = vld [vmem:[%s3351_s18 + $0x1d0] sm:$0xf]  ;;  %v2818_v32 = vld [vmem:[%s3351_s18 + $0x1d4] sm:$0xf0]  ;;  %1141 = vmatpush.bf16.msra.mxu1 %v2331_v17  ;;  %v2387_v34 = vor.u32 %v2802_v30, %v2386_v28  ;;  %v2768_v36 = vld [vmem:[%s3351_s18 + $0x44] sm:$0xf0] }
  0x44   : > { %1155 = vmatpush.bf16.msra.mxu2 %v2395_v21  ;;  %v2314_v37 = vld [vmem:[%s3351_s18 + $0xc0] sm:$0xf]  ;;  %v2451_v38 = vor.u32 %v2818_v32, %v2450_v31  ;;  %v2784_v39 = vld [vmem:[%s3351_s18 + $0xc4] sm:$0xf0]  ;;  %v2251_v44 = vor.u32 %v2768_v36, %v2250_v35  ;;  %v2242_v47 = vld [vmem:[%s3351_s18 + $0x30] sm:$0xf] }
  0x45   : > { %1169 = vmatpush.bf16.msra.mxu3 %v2459_v25  ;;  %v2378_v40 = vld [vmem:[%s3351_s18 + $0x140] sm:$0xf]  ;;  %v2800_v41 = vld [vmem:[%s3351_s18 + $0x144] sm:$0xf0]  ;;  %v2315_v45 = vor.u32 %v2784_v39, %v2314_v37  ;;  %v2766_v48 = vld [vmem:[%s3351_s18 + $0x34] sm:$0xf0] }
  0x46   : > { %v2442_v42 = vld [vmem:[%s3351_s18 + $0x1c0] sm:$0xf]  ;;  %v2816_v43 = vld [vmem:[%s3351_s18 + $0x1c4] sm:$0xf0]  ;;  %1128 = vmatpush.bf16.msra.mxu0 %v2259_v29  ;;  %v2379_v46 = vor.u32 %v2800_v41, %v2378_v40  ;;  %v2306_v49 = vld [vmem:[%s3351_s18 + $0xb0] sm:$0xf]  ;;  %v2243_v56 = vor.u32 %v2766_v48, %v2242_v47 }
  0x47   : > { %1142 = vmatpush.bf16.msra.mxu1 %v2323_v33  ;;  %v2443_v50 = vor.u32 %v2816_v43, %v2442_v42  ;;  %v2782_v51 = vld [vmem:[%s3351_s18 + $0xb4] sm:$0xf0]  ;;  %v2370_v52 = vld [vmem:[%s3351_s18 + $0x130] sm:$0xf]  ;;  %v2234_v59 = vld [vmem:[%s3351_s18 + $0x20] sm:$0xf] }
  0x48   : > { %1156 = vmatpush.bf16.msra.mxu2 %v2387_v34  ;;  %v2798_v53 = vld [vmem:[%s3351_s18 + $0x134] sm:$0xf0]  ;;  %v2434_v54 = vld [vmem:[%s3351_s18 + $0x1b0] sm:$0xf]  ;;  %v2307_v57 = vor.u32 %v2782_v51, %v2306_v49  ;;  %v2764_v60 = vld [vmem:[%s3351_s18 + $0x24] sm:$0xf0] }
  0x49   : > { %1170 = vmatpush.bf16.msra.mxu3 %v2451_v38  ;;  %v2814_v55 = vld [vmem:[%s3351_s18 + $0x1b4] sm:$0xf0]  ;;  %v2371_v58 = vor.u32 %v2798_v53, %v2370_v52  ;;  %v2298_v61 = vld [vmem:[%s3351_s18 + $0xa0] sm:$0xf]  ;;  %v2780_v63 = vld [vmem:[%s3351_s18 + $0xa4] sm:$0xf0]  ;;  %v2235_v4 = vor.u32 %v2764_v60, %v2234_v59 }
  0x4a   : > { %1129 = vmatpush.bf16.msra.mxu0 %v2251_v44  ;;  %v2435_v62 = vor.u32 %v2814_v55, %v2434_v54  ;;  %v2362_v0 = vld [vmem:[%s3351_s18 + $0x120] sm:$0xf]  ;;  %v2796_v1 = vld [vmem:[%s3351_s18 + $0x124] sm:$0xf0]  ;;  %v2299_v5 = vor.u32 %v2780_v63, %v2298_v61  ;;  %v2226_v7 = vld [vmem:[%s3351_s18 + $0x10] sm:$0xf] }
  0x4b   : > { %1143 = vmatpush.bf16.msra.mxu1 %v2315_v45  ;;  %v2426_v2 = vld [vmem:[%s3351_s18 + $0x1a0] sm:$0xf]  ;;  %v2812_v3 = vld [vmem:[%s3351_s18 + $0x1a4] sm:$0xf0]  ;;  %v2363_v6 = vor.u32 %v2796_v1, %v2362_v0  ;;  %v2762_v8 = vld [vmem:[%s3351_s18 + $0x14] sm:$0xf0] }
  0x4c   : > { %1157 = vmatpush.bf16.msra.mxu2 %v2379_v46  ;;  %v2290_v9 = vld [vmem:[%s3351_s18 + $0x90] sm:$0xf]  ;;  %v2427_v10 = vor.u32 %v2812_v3, %v2426_v2  ;;  %v2778_v11 = vld [vmem:[%s3351_s18 + $0x94] sm:$0xf0]  ;;  %v2227_v16 = vor.u32 %v2762_v8, %v2226_v7  ;;  %v2218_v17 = vld [vmem:[%s3351_s18] sm:$0xf] }
  0x4d   : > { %1171 = vmatpush.bf16.msra.mxu3 %v2443_v50  ;;  %v2354_v12 = vld [vmem:[%s3351_s18 + $0x110] sm:$0xf]  ;;  %v2794_v13 = vld [vmem:[%s3351_s18 + $0x114] sm:$0xf0]  ;;  %v2760_v18 = vld [vmem:[%s3351_s18 + $0x4] sm:$0xf0]  ;;  %v2291_v19 = vor.u32 %v2778_v11, %v2290_v9 }
  0x4e   : > { %1130 = vmatpush.bf16.msra.mxu0 %v2243_v56  ;;  %v2418_v14 = vld [vmem:[%s3351_s18 + $0x190] sm:$0xf]  ;;  %v2810_v15 = vld [vmem:[%s3351_s18 + $0x194] sm:$0xf0]  ;;  %v2355_v20 = vor.u32 %v2794_v13, %v2354_v12  ;;  %v2282_v21 = vld [vmem:[%s3351_s18 + $0x80] sm:$0xf]  ;;  %v2219_v31 = vor.u32 %v2760_v18, %v2218_v17 }
  0x4f   : > { %1144 = vmatpush.bf16.msra.mxu1 %v2307_v57  ;;  %v2776_v22 = vld [vmem:[%s3351_s18 + $0x84] sm:$0xf0]  ;;  %v2346_v23 = vld [vmem:[%s3351_s18 + $0x100] sm:$0xf]  ;;  %v2419_v24 = vor.u32 %v2810_v15, %v2418_v14  ;;  %v2530_v28 = vld [vmem:[%s3351_s18 + $0x270] sm:$0xf] }
  0x50   : > { %1158 = vmatpush.bf16.msra.mxu2 %v2371_v58  ;;  %v2792_v25 = vld [vmem:[%s3351_s18 + $0x104] sm:$0xf0]  ;;  %v2410_v26 = vld [vmem:[%s3351_s18 + $0x180] sm:$0xf]  ;;  %v2838_v29 = vld [vmem:[%s3351_s18 + $0x274] sm:$0xf0]  ;;  %v2283_v35 = vor.u32 %v2776_v22, %v2282_v21 }
  0x51   : > { %1172 = vmatpush.bf16.msra.mxu3 %v2435_v62  ;;  %v2808_v27 = vld [vmem:[%s3351_s18 + $0x184] sm:$0xf0]  ;;  %v2594_v30 = vld [vmem:[%s3351_s18 + $0x2f0] sm:$0xf]  ;;  %v2854_v32 = vld [vmem:[%s3351_s18 + $0x2f4] sm:$0xf0]  ;;  %v2347_v36 = vor.u32 %v2792_v25, %v2346_v23  ;;  %v2531_v40 = vor.u32 %v2838_v29, %v2530_v28 }
  0x52   : > { %1131 = vmatpush.bf16.msra.mxu0 %v2235_v4  ;;  %v2658_v33 = vld [vmem:[%s3351_s18 + $0x370] sm:$0xf]  ;;  %v2870_v34 = vld [vmem:[%s3351_s18 + $0x374] sm:$0xf0]  ;;  %v2411_v39 = vor.u32 %v2808_v27, %v2410_v26  ;;  %v2522_v41 = vld [vmem:[%s3351_s18 + $0x260] sm:$0xf]  ;;  %v2595_v43 = vor.u32 %v2854_v32, %v2594_v30 }
  0x53   : > { %1145 = vmatpush.bf16.msra.mxu1 %v2299_v5  ;;  %v2722_v37 = vld [vmem:[%s3351_s18 + $0x3f0] sm:$0xf]  ;;  %v2886_v38 = vld [vmem:[%s3351_s18 + $0x3f4] sm:$0xf0]  ;;  %v2836_v42 = vld [vmem:[%s3351_s18 + $0x264] sm:$0xf0]  ;;  %v2659_v44 = vor.u32 %v2870_v34, %v2658_v33 }
  0x54   : > { %1159 = vmatpush.bf16.msra.mxu2 %v2363_v6  ;;  %v2586_v45 = vld [vmem:[%s3351_s18 + $0x2e0] sm:$0xf]  ;;  %v2852_v46 = vld [vmem:[%s3351_s18 + $0x2e4] sm:$0xf0]  ;;  %v2723_v48 = vor.u32 %v2886_v38, %v2722_v37  ;;  %v2523_v55 = vor.u32 %v2836_v42, %v2522_v41  ;;  %v2514_v56 = vld [vmem:[%s3351_s18 + $0x250] sm:$0xf] }
  0x55   : > { %1173 = vmatpush.bf16.msra.mxu3 %v2427_v10  ;;  %v2650_v47 = vld [vmem:[%s3351_s18 + $0x360] sm:$0xf]  ;;  %v2868_v49 = vld [vmem:[%s3351_s18 + $0x364] sm:$0xf0]  ;;  %v2834_v57 = vld [vmem:[%s3351_s18 + $0x254] sm:$0xf0]  ;;  %v2587_v60 = vor.u32 %v2852_v46, %v2586_v45 }
  0x56   : > { %1132 = vmatpush.bf16.msra.mxu0 %v2227_v16  ;;  %v2714_v50 = vld [vmem:[%s3351_s18 + $0x3e0] sm:$0xf]  ;;  %v2884_v51 = vld [vmem:[%s3351_s18 + $0x3e4] sm:$0xf0]  ;;  %v2651_v61 = vor.u32 %v2868_v49, %v2650_v47  ;;  %v2578_v62 = vld [vmem:[%s3351_s18 + $0x2d0] sm:$0xf]  ;;  %v2515_v9 = vor.u32 %v2834_v57, %v2514_v56 }
  0x57   : > { %1146 = vmatpush.bf16.msra.mxu1 %v2291_v19  ;;  %v2186_v52 = vld [vmem:[#allocation3] sm:$0xf]  ;;  %v2194_v54 = vld [vmem:[#allocation3 + $0x8] sm:$0xf]  ;;  %v2850_v63 = vld [vmem:[%s3351_s18 + $0x2d4] sm:$0xf0]  ;;  %v2715_v2 = vor.u32 %v2884_v51, %v2714_v50 }
  0x58   : > { %1160 = vmatpush.bf16.msra.mxu2 %v2355_v20  ;;  %v2755_v53 = vld [vmem:[#allocation3 + $0x1c] sm:$0xf0]  ;;  %v2756_v59 = vld [vmem:[#allocation3 + $0x24] sm:$0xf0]  ;;  %v2642_v0 = vld [vmem:[%s3351_s18 + $0x350] sm:$0xf]  ;;  %v2579_v12 = vor.u32 %v2850_v63, %v2578_v62 }
  0x59   : > { %1174 = vmatpush.bf16.msra.mxu3 %v2419_v24  ;;  %v3447_v58 = vor.u32 %v2755_v53, %v2186_v52  ;;  %v3452_v1 = vor.u32 %v2756_v59, %v2194_v54  ;;  %v2866_v3 = vld [vmem:[%s3351_s18 + $0x354] sm:$0xf0]  ;;  %v2706_v4 = vld [vmem:[%s3351_s18 + $0x3d0] sm:$0xf]  ;;  %v2751_v6 = vld [vmem:[#allocation3 + $0x4] sm:$0xf] }
  0x5a   : > { %1133 = vmatpush.bf16.msra.mxu0 %v2219_v31  ;;  %v2882_v5 = vld [vmem:[%s3351_s18 + $0x3d4] sm:$0xf0]  ;;  %v2188_v7 = vld [vmem:[#allocation3 + $0x20] sm:$0xf0]  ;;  %v2752_v8 = vld [vmem:[#allocation3 + $0xc] sm:$0xf]  ;;  %v2643_v13 = vor.u32 %v2866_v3, %v2642_v0 }
  0x5b   : > { %1147 = vmatpush.bf16.msra.mxu1 %v2283_v35  ;;  %v3459_v10 = vor.u32 %v2751_v6, %v2188_v7  ;;  %v2196_v11 = vld [vmem:[#allocation3 + $0x28] sm:$0xf0]  ;;  %v2506_v14 = vld [vmem:[%s3351_s18 + $0x240] sm:$0xf]  ;;  %v2832_v15 = vld [vmem:[%s3351_s18 + $0x244] sm:$0xf0]  ;;  %v2707_v18 = vor.u32 %v2882_v5, %v2706_v4 }
  0x5c   : > { %1161 = vmatpush.bf16.msra.mxu2 %v2347_v36  ;;  %v2570_v16 = vld [vmem:[%s3351_s18 + $0x2c0] sm:$0xf]  ;;  %v3464_v17 = vor.u32 %v2752_v8, %v2196_v11  ;;  %v2848_v19 = vld [vmem:[%s3351_s18 + $0x2c4] sm:$0xf0]  ;;  %v2507_v24 = vor.u32 %v2832_v15, %v2506_v14  ;;  %v2498_v27 = vld [vmem:[%s3351_s18 + $0x230] sm:$0xf] }
  0x5d   : > { %1175 = vmatpush.bf16.msra.mxu3 %v2411_v39  ;;  %1134 = vmatmul.bf16.vlgmr.msra.gmra.mxu0 %v3447_v58  ;;  %v2634_v20 = vld [vmem:[%s3351_s18 + $0x340] sm:$0xf]  ;;  %v2864_v21 = vld [vmem:[%s3351_s18 + $0x344] sm:$0xf0]  ;;  %v2571_v25 = vor.u32 %v2848_v19, %v2570_v16  ;;  %v2830_v28 = vld [vmem:[%s3351_s18 + $0x234] sm:$0xf0] }
  0x5e   : > { %1182 = vmatpush.bf16.msrb.mxu0 %v2531_v40  ;;  %1148 = vmatmul.bf16.vlgmr.msra.gmra.mxu1 %v3459_v10  ;;  %v2698_v22 = vld [vmem:[%s3351_s18 + $0x3c0] sm:$0xf]  ;;  %v2880_v23 = vld [vmem:[%s3351_s18 + $0x3c4] sm:$0xf0]  ;;  %v2635_v26 = vor.u32 %v2864_v21, %v2634_v20  ;;  %v2562_v29 = vld [vmem:[%s3351_s18 + $0x2b0] sm:$0xf]  ;;  %v2499_v36 = vor.u32 %v2830_v28, %v2498_v27 }
  0x5f   : > { %1196 = vmatpush.bf16.msrb.mxu1 %v2595_v43  ;;  %1162 = vmatmul.bf16.vlgmr.msra.gmra.mxu2 %v3452_v1  ;;  %v2699_v30 = vor.u32 %v2880_v23, %v2698_v22  ;;  %v2846_v31 = vld [vmem:[%s3351_s18 + $0x2b4] sm:$0xf0]  ;;  %v2626_v32 = vld [vmem:[%s3351_s18 + $0x330] sm:$0xf]  ;;  %v2490_v39 = vld [vmem:[%s3351_s18 + $0x220] sm:$0xf] }
  0x60   : > { %1210 = vmatpush.bf16.msrb.mxu2 %v2659_v44  ;;  %1176 = vmatmul.bf16.vlgmr.msra.gmra.mxu3 %v3464_v17  ;;  %v2862_v33 = vld [vmem:[%s3351_s18 + $0x334] sm:$0xf0]  ;;  %v2690_v34 = vld [vmem:[%s3351_s18 + $0x3b0] sm:$0xf]  ;;  %v2563_v37 = vor.u32 %v2846_v31, %v2562_v29  ;;  %v2828_v40 = vld [vmem:[%s3351_s18 + $0x224] sm:$0xf0] }
  0x61   : > { %1224 = vmatpush.bf16.msrb.mxu3 %v2723_v48  ;;  %v2878_v35 = vld [vmem:[%s3351_s18 + $0x3b4] sm:$0xf0]  ;;  %v2627_v38 = vor.u32 %v2862_v33, %v2626_v32  ;;  %v2554_v41 = vld [vmem:[%s3351_s18 + $0x2a0] sm:$0xf]  ;;  %v2844_v43 = vld [vmem:[%s3351_s18 + $0x2a4] sm:$0xf0]  ;;  %v2491_v48 = vor.u32 %v2828_v40, %v2490_v39 }
  0x62   : > { %1183 = vmatpush.bf16.msrb.mxu0 %v2523_v55  ;;  %v2691_v42 = vor.u32 %v2878_v35, %v2690_v34  ;;  %v2618_v44 = vld [vmem:[%s3351_s18 + $0x320] sm:$0xf]  ;;  %v2860_v45 = vld [vmem:[%s3351_s18 + $0x324] sm:$0xf0]  ;;  %v2482_v49 = vld [vmem:[%s3351_s18 + $0x210] sm:$0xf]  ;;  %v2555_v50 = vor.u32 %v2844_v43, %v2554_v41 }
  0x63   : > { %1197 = vmatpush.bf16.msrb.mxu1 %v2587_v60  ;;  %v2682_v46 = vld [vmem:[%s3351_s18 + $0x3a0] sm:$0xf]  ;;  %v2876_v47 = vld [vmem:[%s3351_s18 + $0x3a4] sm:$0xf0]  ;;  %v2619_v51 = vor.u32 %v2860_v45, %v2618_v44  ;;  %v2826_v52 = vld [vmem:[%s3351_s18 + $0x214] sm:$0xf0] }
  0x64   : > { %1211 = vmatpush.bf16.msrb.mxu2 %v2651_v61  ;;  %v2546_v53 = vld [vmem:[%s3351_s18 + $0x290] sm:$0xf]  ;;  %v2842_v54 = vld [vmem:[%s3351_s18 + $0x294] sm:$0xf0]  ;;  %v2683_v55 = vor.u32 %v2876_v47, %v2682_v46  ;;  %v2474_v61 = vld [vmem:[%s3351_s18 + $0x200] sm:$0xf]  ;;  %v2483_v63 = vor.u32 %v2826_v52, %v2482_v49 }
  0x65   : > { %1225 = vmatpush.bf16.msrb.mxu3 %v2715_v2  ;;  %v2610_v56 = vld [vmem:[%s3351_s18 + $0x310] sm:$0xf]  ;;  %v2858_v57 = vld [vmem:[%s3351_s18 + $0x314] sm:$0xf0]  ;;  %v2824_v62 = vld [vmem:[%s3351_s18 + $0x204] sm:$0xf0]  ;;  %v2547_v5 = vor.u32 %v2842_v54, %v2546_v53 }
  0x66   : > { %1184 = vmatpush.bf16.msrb.mxu0 %v2515_v9  ;;  %v2674_v59 = vld [vmem:[%s3351_s18 + $0x390] sm:$0xf]  ;;  %v2874_v60 = vld [vmem:[%s3351_s18 + $0x394] sm:$0xf0]  ;;  %v2538_v0 = vld [vmem:[%s3351_s18 + $0x280] sm:$0xf]  ;;  %v2611_v6 = vor.u32 %v2858_v57, %v2610_v56  ;;  %v2475_v19 = vor.u32 %v2824_v62, %v2474_v61 }
  0x67   : > { %1198 = vmatpush.bf16.msrb.mxu1 %v2579_v12  ;;  %v2840_v2 = vld [vmem:[%s3351_s18 + $0x284] sm:$0xf0]  ;;  %v2602_v3 = vld [vmem:[%s3351_s18 + $0x300] sm:$0xf]  ;;  %v2773_v9 = vld [vmem:[%s3351_s18 + $0x74] sm:$0xf]  ;;  %v2675_v11 = vor.u32 %v2874_v60, %v2674_v59 }
  0x68   : > { %1212 = vmatpush.bf16.msrb.mxu2 %v2643_v13  ;;  %v2856_v4 = vld [vmem:[%s3351_s18 + $0x304] sm:$0xf0]  ;;  %v2666_v7 = vld [vmem:[%s3351_s18 + $0x380] sm:$0xf]  ;;  %v2276_v12 = vld [vmem:[%s3351_s18 + $0x78] sm:$0xf0]  ;;  %v2539_v23 = vor.u32 %v2840_v2, %v2538_v0 }
  0x69   : > { %1226 = vmatpush.bf16.msrb.mxu3 %v2707_v18  ;;  %v2872_v8 = vld [vmem:[%s3351_s18 + $0x384] sm:$0xf0]  ;;  %v2789_v13 = vld [vmem:[%s3351_s18 + $0xf4] sm:$0xf]  ;;  %v2340_v14 = vld [vmem:[%s3351_s18 + $0xf8] sm:$0xf0]  ;;  %v2279_v29 = vor.u32 %v2773_v9, %v2276_v12 }
  0x6a   : > { %1185 = vmatpush.bf16.msrb.mxu0 %v2507_v24  ;;  %v2805_v15 = vld [vmem:[%s3351_s18 + $0x174] sm:$0xf]  ;;  %v2404_v16 = vld [vmem:[%s3351_s18 + $0x178] sm:$0xf0]  ;;  %v2202_v21 = vld [vmem:[#allocation3 + $0x10] sm:$0xf]  ;;  %v2603_v24 = vor.u32 %v2856_v4, %v2602_v3  ;;  %v2667_v28 = vor.u32 %v2872_v8, %v2666_v7  ;;  %v2343_v33 = vor.u32 %v2789_v13, %v2340_v14 }
  0x6b   : > { %1199 = vmatpush.bf16.msrb.mxu1 %v2571_v25  ;;  %v2821_v18 = vld [vmem:[%s3351_s18 + $0x1f4] sm:$0xf]  ;;  %v2468_v20 = vld [vmem:[%s3351_s18 + $0x1f8] sm:$0xf0]  ;;  %v2757_v22 = vld [vmem:[#allocation3 + $0x2c] sm:$0xf0]  ;;  %v2407_v34 = vor.u32 %v2805_v15, %v2404_v16 }
  0x6c   : > { %1213 = vmatpush.bf16.msrb.mxu2 %v2635_v26  ;;  %v2210_v25 = vld [vmem:[#allocation3 + $0x18] sm:$0xf]  ;;  %v2753_v27 = vld [vmem:[#allocation3 + $0x14] sm:$0xf]  ;;  %v2754_v31 = vld [vmem:[#allocation3 + $0x1c] sm:$0xf]  ;;  %v3516_v39 = vor.u32 %v2757_v22, %v2202_v21 }
  0x6d   : > { %1227 = vmatpush.bf16.msrb.mxu3 %v2699_v30  ;;  %v2758_v26 = vld [vmem:[#allocation3 + $0x34] sm:$0xf0]  ;;  %v2204_v30 = vld [vmem:[#allocation3 + $0x30] sm:$0xf0]  ;;  %v2212_v32 = vld [vmem:[#allocation3 + $0x38] sm:$0xf0] }
  0x6e   : > { %1186 = vmatpush.bf16.msrb.mxu0 %v2499_v36  ;;  %v2771_v35 = vld [vmem:[%s3351_s18 + $0x64] sm:$0xf]  ;;  %v2268_v36 = vld [vmem:[%s3351_s18 + $0x68] sm:$0xf0]  ;;  %v3521_v43 = vor.u32 %v2758_v26, %v2210_v25  ;;  %v3523_v44 = vor.u32 %v2753_v27, %v2204_v30  ;;  %v3527_v47 = vor.u32 %v2754_v31, %v2212_v32  ;;  %v2260_v52 = vld [vmem:[%s3351_s18 + $0x58] sm:$0xf0] }
  0x6f   : > { %1200 = vmatpush.bf16.msrb.mxu1 %v2563_v37  ;;  %v2787_v37 = vld [vmem:[%s3351_s18 + $0xe4] sm:$0xf]  ;;  %v2332_v40 = vld [vmem:[%s3351_s18 + $0xe8] sm:$0xf0]  ;;  %v2785_v53 = vld [vmem:[%s3351_s18 + $0xd4] sm:$0xf] }
  0x70   : > { %1214 = vmatpush.bf16.msrb.mxu2 %v2627_v38  ;;  %v2471_v38 = vor.u32 %v2821_v18, %v2468_v20  ;;  %v2803_v41 = vld [vmem:[%s3351_s18 + $0x164] sm:$0xf]  ;;  %v2460_v46 = vld [vmem:[%s3351_s18 + $0x1e8] sm:$0xf0]  ;;  %v2335_v49 = vor.u32 %v2787_v37, %v2332_v40  ;;  %v2801_v56 = vld [vmem:[%s3351_s18 + $0x154] sm:$0xf] }
  0x71   : > { %1228 = vmatpush.bf16.msrb.mxu3 %v2691_v42  ;;  %v2396_v42 = vld [vmem:[%s3351_s18 + $0x168] sm:$0xf0]  ;;  %v2819_v45 = vld [vmem:[%s3351_s18 + $0x1e4] sm:$0xf]  ;;  %v2388_v57 = vld [vmem:[%s3351_s18 + $0x158] sm:$0xf0] }
  0x72   : > { %1187 = vmatpush.bf16.msrb.mxu0 %v2491_v48  ;;  %v2271_v48 = vor.u32 %v2771_v35, %v2268_v36  ;;  %v2463_v54 = vor.u32 %v2819_v45, %v2460_v46  ;;  %v2817_v59 = vld [vmem:[%s3351_s18 + $0x1d4] sm:$0xf]  ;;  %v2452_v60 = vld [vmem:[%s3351_s18 + $0x1d8] sm:$0xf0]  ;;  %v2767_v0 = vld [vmem:[%s3351_s18 + $0x44] sm:$0xf] }
  0x73   : > { %1201 = vmatpush.bf16.msrb.mxu1 %v2555_v50  ;;  %v2399_v50 = vor.u32 %v2803_v41, %v2396_v42  ;;  %v2252_v2 = vld [vmem:[%s3351_s18 + $0x48] sm:$0xf0]  ;;  %v2783_v3 = vld [vmem:[%s3351_s18 + $0xc4] sm:$0xf]  ;;  %v2455_v4 = vor.u32 %v2817_v59, %v2452_v60  ;;  %v2765_v14 = vld [vmem:[%s3351_s18 + $0x34] sm:$0xf] }
  0x74   : > { %1215 = vmatpush.bf16.msrb.mxu2 %v2619_v51  ;;  %v2769_v51 = vld [vmem:[%s3351_s18 + $0x54] sm:$0xf]  ;;  %v2380_v7 = vld [vmem:[%s3351_s18 + $0x148] sm:$0xf0]  ;;  %v2815_v8 = vld [vmem:[%s3351_s18 + $0x1c4] sm:$0xf] }
  0x75   : > { %1229 = vmatpush.bf16.msrb.mxu3 %v2683_v55  ;;  %v2324_v55 = vld [vmem:[%s3351_s18 + $0xd8] sm:$0xf0]  ;;  %v2263_v61 = vor.u32 %v2769_v51, %v2260_v52  ;;  %v2444_v9 = vld [vmem:[%s3351_s18 + $0x1c8] sm:$0xf0]  ;;  %v2781_v16 = vld [vmem:[%s3351_s18 + $0xb4] sm:$0xf] }
  0x76   : > { %1188 = vmatpush.bf16.msrb.mxu0 %v2483_v63  ;;  %v2327_v62 = vor.u32 %v2785_v53, %v2324_v55  ;;  %v2391_v63 = vor.u32 %v2801_v56, %v2388_v57  ;;  %v2244_v15 = vld [vmem:[%s3351_s18 + $0x38] sm:$0xf0]  ;;  %v2447_v18 = vor.u32 %v2815_v8, %v2444_v9  ;;  %v2797_v20 = vld [vmem:[%s3351_s18 + $0x134] sm:$0xf]  ;;  %v2763_v27 = vld [vmem:[%s3351_s18 + $0x24] sm:$0xf] }
  0x77   : > { %1202 = vmatpush.bf16.msrb.mxu1 %v2547_v5  ;;  %v2316_v5 = vld [vmem:[%s3351_s18 + $0xc8] sm:$0xf0]  ;;  %v2372_v21 = vld [vmem:[%s3351_s18 + $0x138] sm:$0xf0]  ;;  %v2813_v22 = vld [vmem:[%s3351_s18 + $0x1b4] sm:$0xf] }
  0x78   : > { %1216 = vmatpush.bf16.msrb.mxu2 %v2611_v6  ;;  %v2799_v6 = vld [vmem:[%s3351_s18 + $0x144] sm:$0xf]  ;;  %v2319_v12 = vor.u32 %v2783_v3, %v2316_v5  ;;  %v2375_v26 = vor.u32 %v2797_v20, %v2372_v21  ;;  %v2300_v31 = vld [vmem:[%s3351_s18 + $0xa8] sm:$0xf0]  ;;  %v2761_v40 = vld [vmem:[%s3351_s18 + $0x14] sm:$0xf] }
  0x79   : > { %1230 = vmatpush.bf16.msrb.mxu3 %v2675_v11  ;;  %v2255_v11 = vor.u32 %v2767_v0, %v2252_v2  ;;  %v2383_v13 = vor.u32 %v2799_v6, %v2380_v7  ;;  %v2795_v32 = vld [vmem:[%s3351_s18 + $0x124] sm:$0xf]  ;;  %v2428_v35 = vld [vmem:[%s3351_s18 + $0x1a8] sm:$0xf0]  ;;  %v2228_v41 = vld [vmem:[%s3351_s18 + $0x18] sm:$0xf0] }
  0x7a   : > { %1189 = vmatpush.bf16.msrb.mxu0 %v2475_v19  ;;  %v2308_v19 = vld [vmem:[%s3351_s18 + $0xb8] sm:$0xf0]  ;;  %v2777_v42 = vld [vmem:[%s3351_s18 + $0x94] sm:$0xf]  ;;  %v2231_v52 = vor.u32 %v2761_v40, %v2228_v41  ;;  %v2759_v53 = vld [vmem:[%s3351_s18 + $0x4] sm:$0xf] }
  0x7b   : > { %1203 = vmatpush.bf16.msrb.mxu1 %v2539_v23  ;;  %v2436_v23 = vld [vmem:[%s3351_s18 + $0x1b8] sm:$0xf0]  ;;  %v2311_v25 = vor.u32 %v2781_v16, %v2308_v19  ;;  %v2775_v57 = vld [vmem:[%s3351_s18 + $0x84] sm:$0xf]  ;;  %v2284_v59 = vld [vmem:[%s3351_s18 + $0x88] sm:$0xf0] }
  0x7c   : > { %1217 = vmatpush.bf16.msrb.mxu2 %v2603_v24  ;;  %v2247_v24 = vor.u32 %v2765_v14, %v2244_v15  ;;  %v2439_v30 = vor.u32 %v2813_v22, %v2436_v23  ;;  %v2292_v46 = vld [vmem:[%s3351_s18 + $0x98] sm:$0xf0]  ;;  %v2791_v60 = vld [vmem:[%s3351_s18 + $0x104] sm:$0xf]  ;;  %v2412_v0 = vld [vmem:[%s3351_s18 + $0x188] sm:$0xf0]  ;;  %v2287_v9 = vor.u32 %v2775_v57, %v2284_v59 }
  0x7d   : > { %1231 = vmatpush.bf16.msrb.mxu3 %v2667_v28  ;;  %1190 = vmatmul.bf16.vlgmr.msrb.gmra.mxu0 %v3516_v39  ;;  %v2236_v28 = vld [vmem:[%s3351_s18 + $0x28] sm:$0xf0]  ;;  %v2420_v51 = vld [vmem:[%s3351_s18 + $0x198] sm:$0xf0]  ;;  %v2295_v55 = vor.u32 %v2777_v42, %v2292_v46  ;;  %v2837_v2 = vld [vmem:[%s3351_s18 + $0x274] sm:$0xf] }
  0x7e   : > { %1238 = vmatpush.bf16.msra.mxu0 %v2279_v29  ;;  %1204 = vmatmul.bf16.vlgmr.msrb.gmra.mxu1 %v3523_v44  ;;  %v2779_v29 = vld [vmem:[%s3351_s18 + $0xa4] sm:$0xf]  ;;  %v2239_v36 = vor.u32 %v2763_v27, %v2236_v28  ;;  %v2532_v3 = vld [vmem:[%s3351_s18 + $0x278] sm:$0xf0]  ;;  %v2869_v7 = vld [vmem:[%s3351_s18 + $0x374] sm:$0xf] }
  0x7f   : > { %1252 = vmatpush.bf16.msra.mxu1 %v2343_v33  ;;  %1218 = vmatmul.bf16.vlgmr.msrb.gmra.mxu2 %v3521_v43  ;;  %v2364_v33 = vld [vmem:[%s3351_s18 + $0x128] sm:$0xf0]  ;;  %v2303_v37 = vor.u32 %v2779_v29, %v2300_v31  ;;  %v2596_v6 = vld [vmem:[%s3351_s18 + $0x2f8] sm:$0xf0]  ;;  %v2535_v15 = vor.u32 %v2837_v2, %v2532_v3  ;;  %v2835_v19 = vld [vmem:[%s3351_s18 + $0x264] sm:$0xf] }
  0x80   : > { %1266 = vmatpush.bf16.msra.mxu2 %v2407_v34  ;;  %1232 = vmatmul.bf16.vlgmr.msrb.gmra.mxu3 %v3527_v47  ;;  %v2811_v34 = vld [vmem:[%s3351_s18 + $0x1a4] sm:$0xf]  ;;  %v2660_v8 = vld [vmem:[%s3351_s18 + $0x378] sm:$0xf0]  ;;  %v2524_v20 = vld [vmem:[%s3351_s18 + $0x268] sm:$0xf0] }
  0x81   : > { %1280 = vmatpush.bf16.msra.mxu3 %v2471_v38  ;;  %v2367_v38 = vor.u32 %v2795_v32, %v2364_v33  ;;  %v2431_v45 = vor.u32 %v2811_v34, %v2428_v35  ;;  %v2851_v21 = vld [vmem:[%s3351_s18 + $0x2e4] sm:$0xf]  ;;  %v2588_v23 = vld [vmem:[%s3351_s18 + $0x2e8] sm:$0xf0]  ;;  %v2527_v28 = vor.u32 %v2835_v19, %v2524_v20  ;;  %v2833_v31 = vld [vmem:[%s3351_s18 + $0x254] sm:$0xf] }
  0x82   : > { %1239 = vmatpush.bf16.msra.mxu0 %v2271_v48  ;;  %v2793_v48 = vld [vmem:[%s3351_s18 + $0x114] sm:$0xf]  ;;  %v2716_v27 = vld [vmem:[%s3351_s18 + $0x3e8] sm:$0xf0]  ;;  %v2591_v29 = vor.u32 %v2851_v21, %v2588_v23  ;;  %v2516_v32 = vld [vmem:[%s3351_s18 + $0x258] sm:$0xf0] }
  0x83   : > { %1253 = vmatpush.bf16.msra.mxu1 %v2335_v49  ;;  %v2356_v49 = vld [vmem:[%s3351_s18 + $0x118] sm:$0xf0]  ;;  %v2849_v33 = vld [vmem:[%s3351_s18 + $0x2d4] sm:$0xf]  ;;  %v2519_v41 = vor.u32 %v2833_v31, %v2516_v32  ;;  %v2847_v46 = vld [vmem:[%s3351_s18 + $0x2c4] sm:$0xf] }
  0x84   : > { %1267 = vmatpush.bf16.msra.mxu2 %v2399_v50  ;;  %v2809_v50 = vld [vmem:[%s3351_s18 + $0x194] sm:$0xf]  ;;  %v2359_v56 = vor.u32 %v2793_v48, %v2356_v49  ;;  %v2580_v35 = vld [vmem:[%s3351_s18 + $0x2d8] sm:$0xf0]  ;;  %v2572_v49 = vld [vmem:[%s3351_s18 + $0x2c8] sm:$0xf0] }
  0x85   : > { %1281 = vmatpush.bf16.msra.mxu3 %v2463_v54  ;;  %v2220_v54 = vld [vmem:[%s3351_s18 + $0x8] sm:$0xf0]  ;;  %v2708_v40 = vld [vmem:[%s3351_s18 + $0x3d8] sm:$0xf0]  ;;  %v2845_v57 = vld [vmem:[%s3351_s18 + $0x2b4] sm:$0xf] }
  0x86   : > { %1240 = vmatpush.bf16.msra.mxu0 %v2263_v61  ;;  %v2423_v61 = vor.u32 %v2809_v50, %v2420_v51  ;;  %v2223_v5 = vor.u32 %v2759_v53, %v2220_v54  ;;  %v2636_v50 = vld [vmem:[%s3351_s18 + $0x348] sm:$0xf0]  ;;  %v2879_v51 = vld [vmem:[%s3351_s18 + $0x3c4] sm:$0xf]  ;;  %v2575_v53 = vor.u32 %v2847_v46, %v2572_v49  ;;  %v2825_v19 = vld [vmem:[%s3351_s18 + $0x214] sm:$0xf] }
  0x87   : > { %1254 = vmatpush.bf16.msra.mxu1 %v2327_v62  ;;  %v2348_v62 = vld [vmem:[%s3351_s18 + $0x108] sm:$0xf0]  ;;  %v2484_v20 = vld [vmem:[%s3351_s18 + $0x218] sm:$0xf0]  ;;  %v2841_v21 = vld [vmem:[%s3351_s18 + $0x294] sm:$0xf] }
  0x88   : > { %1268 = vmatpush.bf16.msra.mxu2 %v2391_v63  ;;  %v2807_v63 = vld [vmem:[%s3351_s18 + $0x184] sm:$0xf]  ;;  %v2548_v23 = vld [vmem:[%s3351_s18 + $0x298] sm:$0xf0]  ;;  %v2476_v32 = vld [vmem:[%s3351_s18 + $0x208] sm:$0xf0] }
  0x89   : > { %1282 = vmatpush.bf16.msra.mxu3 %v2455_v4  ;;  %v2853_v4 = vld [vmem:[%s3351_s18 + $0x2f4] sm:$0xf]  ;;  %v2415_v14 = vor.u32 %v2807_v63, %v2412_v0  ;;  %v2692_v0 = vld [vmem:[%s3351_s18 + $0x3b8] sm:$0xf0]  ;;  %v2823_v31 = vld [vmem:[%s3351_s18 + $0x204] sm:$0xf] }
  0x8a   : > { %1241 = vmatpush.bf16.msra.mxu0 %v2255_v11  ;;  %v2351_v11 = vor.u32 %v2791_v60, %v2348_v62  ;;  %v2599_v16 = vor.u32 %v2853_v4, %v2596_v6  ;;  %v2564_v60 = vld [vmem:[%s3351_s18 + $0x2b8] sm:$0xf0]  ;;  %v2877_v63 = vld [vmem:[%s3351_s18 + $0x3b4] sm:$0xf]  ;;  %v2492_v6 = vld [vmem:[%s3351_s18 + $0x228] sm:$0xf0] }
  0x8b   : > { %1255 = vmatpush.bf16.msra.mxu1 %v2319_v12  ;;  %v2885_v12 = vld [vmem:[%s3351_s18 + $0x3f4] sm:$0xf]  ;;  %v2628_v62 = vld [vmem:[%s3351_s18 + $0x338] sm:$0xf0]  ;;  %v2567_v3 = vor.u32 %v2845_v57, %v2564_v60  ;;  %s2183_s0 = sshll.u32 %s3260_s25, 8  ;;  %p2729_p5 = scmp.ne.s32.totalorder %s3260_s25, 2 }
  0x8c   : > { %1269 = vmatpush.bf16.msra.mxu2 %v2383_v13  ;;  %v2724_v13 = vld [vmem:[%s3351_s18 + $0x3f8] sm:$0xf0]  ;;  %s1350_s7 = sshra.s32 %s2183_s0, 7 }
  0x8d   : > { %1283 = vmatpush.bf16.msra.mxu3 %v2447_v18  ;;  %v2663_v18 = vor.u32 %v2869_v7, %v2660_v8  ;;  %v2727_v22 = vor.u32 %v2885_v12, %v2724_v13  ;;  %v2843_v7 = vld [vmem:[%s3351_s18 + $0x2a4] sm:$0xf]  ;;  %v2695_v8 = vor.u32 %v2877_v63, %v2692_v0  ;;  %v2620_v12 = vld [vmem:[%s3351_s18 + $0x328] sm:$0xf0]  ;;  %s2728_s8 = sshll.u32 %s1350_s7, 3 }
  0x8e   : > { %1242 = vmatpush.bf16.msra.mxu0 %v2247_v24  ;;  %v2867_v24 = vld [vmem:[%s3351_s18 + $0x364] sm:$0xf]  ;;  %s3654_s13 = scalar_lea.vmem [#allocation2], %s2728_s8 }
  0x8f   : > { %1256 = vmatpush.bf16.msra.mxu1 %v2311_v25  ;;  %v2652_v25 = vld [vmem:[%s3351_s18 + $0x368] sm:$0xf0]  ;;  %v2875_v13 = vld [vmem:[%s3351_s18 + $0x3a4] sm:$0xf] }
  0x90   : > { %1270 = vmatpush.bf16.msra.mxu2 %v2375_v26  ;;  %v2883_v26 = vld [vmem:[%s3351_s18 + $0x3e4] sm:$0xf] }
  0x91   : > { %1284 = vmatpush.bf16.msra.mxu3 %v2439_v30  ;;  %v2655_v30 = vor.u32 %v2867_v24, %v2652_v25  ;;  %v2719_v34 = vor.u32 %v2883_v26, %v2716_v27  ;;  %v2857_v24 = vld [vmem:[%s3351_s18 + $0x314] sm:$0xf]  ;;  %v2612_v25 = vld [vmem:[%s3351_s18 + $0x318] sm:$0xf0] }
  0x92   : > { %1243 = vmatpush.bf16.msra.mxu0 %v2239_v36  ;;  %v2865_v36 = vld [vmem:[%s3351_s18 + $0x354] sm:$0xf]  ;;  %v2676_v27 = vld [vmem:[%s3351_s18 + $0x398] sm:$0xf0] }
  0x93   : > { %1257 = vmatpush.bf16.msra.mxu1 %v2303_v37  ;;  %v2644_v37 = vld [vmem:[%s3351_s18 + $0x358] sm:$0xf0]  ;;  %v2873_v26 = vld [vmem:[%s3351_s18 + $0x394] sm:$0xf] }
  0x94   : > { %1271 = vmatpush.bf16.msra.mxu2 %v2367_v38  ;;  %v2881_v38 = vld [vmem:[%s3351_s18 + $0x3d4] sm:$0xf]  ;;  %v2647_v42 = vor.u32 %v2865_v36, %v2644_v37  ;;  %v2855_v36 = vld [vmem:[%s3351_s18 + $0x304] sm:$0xf]  ;;  %v2604_v37 = vld [vmem:[%s3351_s18 + $0x308] sm:$0xf0] }
  0x95   : > { %1285 = vmatpush.bf16.msra.mxu3 %v2431_v45  ;;  %v2831_v45 = vld [vmem:[%s3351_s18 + $0x244] sm:$0xf]  ;;  %v2711_v48 = vor.u32 %v2881_v38, %v2708_v40  ;;  %v2668_v40 = vld [vmem:[%s3351_s18 + $0x388] sm:$0xf0] }
  0x96   : > { %1244 = vmatpush.bf16.msra.mxu0 %v2231_v52  ;;  %v2871_v38 = vld [vmem:[%s3351_s18 + $0x384] sm:$0xf] }
  0x97   : > { %1258 = vmatpush.bf16.msra.mxu1 %v2295_v55  ;;  %v2829_v55 = vld [vmem:[%s3351_s18 + $0x234] sm:$0xf] }
  0x98   : > { %1272 = vmatpush.bf16.msra.mxu2 %v2359_v56  ;;  %v2500_v56 = vld [vmem:[%s3351_s18 + $0x238] sm:$0xf0] }
  0x99   : > { %1286 = vmatpush.bf16.msra.mxu3 %v2423_v61  ;;  %v2861_v61 = vld [vmem:[%s3351_s18 + $0x334] sm:$0xf]  ;;  %v2503_v2 = vor.u32 %v2829_v55, %v2500_v56 }
  0x9a   : > { %1245 = vmatpush.bf16.msra.mxu0 %v2223_v5  ;;  %v2631_v4 = vor.u32 %v2861_v61, %v2628_v62  ;;  %v2827_v5 = vld [vmem:[%s3351_s18 + $0x224] sm:$0xf] }
  0x9b   : > { %1259 = vmatpush.bf16.msra.mxu1 %v2287_v9  ;;  %v2556_v9 = vld [vmem:[%s3351_s18 + $0x2a8] sm:$0xf0] }
  0x9c   : > { %1273 = vmatpush.bf16.msra.mxu2 %v2351_v11  ;;  %v2859_v11 = vld [vmem:[%s3351_s18 + $0x324] sm:$0xf] }
  0x9d   : > { %1287 = vmatpush.bf16.msra.mxu3 %v2415_v14  ;;  %1246 = vmatmul.bf16.vlgmr.msra.gmra.mxu0 %v3447_v58  ;;  %v2863_v58 = vld [vmem:[%s3351_s18 + $0x344] sm:$0xf]  ;;  %v2684_v14 = vld [vmem:[%s3351_s18 + $0x3a8] sm:$0xf0] }
  0x9e   : > { %1294 = vmatpush.bf16.msrb.mxu0 %v2535_v15  ;;  %1260 = vmatmul.bf16.vlgmr.msra.gmra.mxu1 %v3459_v10  ;;  %v2700_v10 = vld [vmem:[%s3351_s18 + $0x3c8] sm:$0xf0]  ;;  %v2639_v54 = vor.u32 %v2863_v58, %v2636_v50  ;;  %v2495_v15 = vor.u32 %v2827_v5, %v2492_v6 }
  0x9f   : > { %1308 = vmatpush.bf16.msrb.mxu1 %v2599_v16  ;;  %1274 = vmatmul.bf16.vlgmr.msra.gmra.mxu2 %v3452_v1  ;;  %v2583_v1 = vor.u32 %v2849_v33, %v2580_v35  ;;  %v2703_v59 = vor.u32 %v2879_v51, %v2700_v10  ;;  %v2559_v16 = vor.u32 %v2843_v7, %v2556_v9  ;;  %v2839_v33 = vld [vmem:[%s3351_s18 + $0x284] sm:$0xf]  ;;  %v2540_v35 = vld [vmem:[%s3351_s18 + $0x288] sm:$0xf0] }
  0xa0   : > { %1322 = vmatpush.bf16.msrb.mxu2 %v2663_v18  ;;  %1288 = vmatmul.bf16.vlgmr.msra.gmra.mxu3 %v3464_v17  ;;  %v2508_v17 = vld [vmem:[%s3351_s18 + $0x248] sm:$0xf0]  ;;  %v2623_v18 = vor.u32 %v2859_v11, %v2620_v12 }
  0xa1   : > { %1336 = vmatpush.bf16.msrb.mxu3 %v2727_v22  ;;  %v2511_v52 = vor.u32 %v2831_v45, %v2508_v17  ;;  %v2687_v22 = vor.u32 %v2875_v13, %v2684_v14  ;;  %v2671_v45 = vor.u32 %v2871_v38, %v2668_v40 }
  0xa2   : > { %1295 = vmatpush.bf16.msrb.mxu0 %v2527_v28  ;;  %v2487_v28 = vor.u32 %v2825_v19, %v2484_v20 }
  0xa3   : > { %1309 = vmatpush.bf16.msrb.mxu1 %v2591_v29  ;;  %v2551_v29 = vor.u32 %v2841_v21, %v2548_v23 }
  0xa4   : > { %1323 = vmatpush.bf16.msrb.mxu2 %v2655_v30  ;;  %v2615_v30 = vor.u32 %v2857_v24, %v2612_v25 }
  0xa5   : > { %1337 = vmatpush.bf16.msrb.mxu3 %v2719_v34  ;;  %v2679_v34 = vor.u32 %v2873_v26, %v2676_v27 }
  0xa6   : > { %1296 = vmatpush.bf16.msrb.mxu0 %v2519_v41  ;;  %v2479_v41 = vor.u32 %v2823_v31, %v2476_v32 }
  0xa7   : > { %1310 = vmatpush.bf16.msrb.mxu1 %v2583_v1  ;;  %v2543_v1 = vor.u32 %v2839_v33, %v2540_v35 }
  0xa8   : > { %1324 = vmatpush.bf16.msrb.mxu2 %v2647_v42  ;;  %v2607_v42 = vor.u32 %v2855_v36, %v2604_v37 }
  0xa9   : > { %1338 = vmatpush.bf16.msrb.mxu3 %v2711_v48 }
  0xaa   : > { %1297 = vmatpush.bf16.msrb.mxu0 %v2511_v52 }
  0xab   : > { %1311 = vmatpush.bf16.msrb.mxu1 %v2575_v53 }
  0xac   : > { %1325 = vmatpush.bf16.msrb.mxu2 %v2639_v54 }
  0xad   : > { %1339 = vmatpush.bf16.msrb.mxu3 %v2703_v59 }
  0xae   : > { %1298 = vmatpush.bf16.msrb.mxu0 %v2503_v2 }
  0xaf   : > { %1312 = vmatpush.bf16.msrb.mxu1 %v2567_v3 }
  0xb0   : > { %1326 = vmatpush.bf16.msrb.mxu2 %v2631_v4 }
  0xb1   : > { %1340 = vmatpush.bf16.msrb.mxu3 %v2695_v8 }
  0xb2   : > { %1299 = vmatpush.bf16.msrb.mxu0 %v2495_v15 }
  0xb3   : > { %1313 = vmatpush.bf16.msrb.mxu1 %v2559_v16 }
  0xb4   : > { %1327 = vmatpush.bf16.msrb.mxu2 %v2623_v18 }
  0xb5   : > { %1341 = vmatpush.bf16.msrb.mxu3 %v2687_v22 }
  0xb6   : > { %1300 = vmatpush.bf16.msrb.mxu0 %v2487_v28 }
  0xb7   : > { %1314 = vmatpush.bf16.msrb.mxu1 %v2551_v29 }
  0xb8   : > { %1328 = vmatpush.bf16.msrb.mxu2 %v2615_v30 }
  0xb9   : > { %1342 = vmatpush.bf16.msrb.mxu3 %v2679_v34 }
  0xba   : > { %1301 = vmatpush.bf16.msrb.mxu0 %v2479_v41 }
  0xbb   : > { %1315 = vmatpush.bf16.msrb.mxu1 %v2543_v1 }
  0xbc   : > { %1329 = vmatpush.bf16.msrb.mxu2 %v2607_v42 }
  0xbd   : > { %1343 = vmatpush.bf16.msrb.mxu3 %v2671_v45  ;;  %1302 = vmatmul.bf16.vlgmr.msrb.gmra.mxu0 %v3516_v39 }
  0xbe   : > { %1316 = vmatmul.bf16.vlgmr.msrb.gmra.mxu1 %v3523_v44 }
  0xbf   : > { %1330 = vmatmul.bf16.vlgmr.msrb.gmra.mxu2 %v3521_v43 }
  0xc0   : > { %1344 = vmatmul.bf16.vlgmr.msrb.gmra.mxu3 %v3527_v47 }
  0xda   : > { %v1135_v17 = vpop.f32.mrf.mxu0 }
  0xdb   : > { %v1149_v46 = vpop.f32.mrf.mxu1 }
  0xdc   : > { %v1150_v58 = vadd.f32 %v1149_v46, %v1135_v17 }
  0xe2   : > { %v1163_v48 = vpop.f32.mrf.mxu2  ;;  %v1137_v50 = vpop.f32.mrf.mxu0 }
  0xe3   : > { %v1177_v49 = vpop.f32.mrf.mxu3  ;;  %v1151_v51 = vpop.f32.mrf.mxu1  ;;  %v1164_v10 = vadd.f32 %v1163_v48, %v1150_v58 }
  0xe4   : > { %v1152_v55 = vadd.f32 %v1151_v51, %v1137_v50 }
  0xe5   : > { %v1178_v52 = vadd.f32 %v1177_v49, %v1164_v10 }
  0xea   : > { %v1165_v53 = vpop.f32.mrf.mxu2 }
  0xeb   : > { %v1179_v54 = vpop.f32.mrf.mxu3  ;;  %v1166_v43 = vadd.f32 %v1165_v53, %v1152_v55 }
  0xed   : > { %v1180_v59 = vadd.f32 %v1179_v54, %v1166_v43 }
  0xfa   : > { %v1191_v39 = vpop.f32.mrf.mxu0 }
  0xfb   : > { %v1192_v44 = vadd.f32 %v1191_v39, %v1178_v52  ;;  %v1205_v56 = vpop.f32.mrf.mxu1 }
  0xfd   : > { %v1206_v57 = vadd.f32 %v1205_v56, %v1192_v44 }
 0x102   : > { %v1219_v47 = vpop.f32.mrf.mxu2  ;;  %v1193_v61 = vpop.f32.mrf.mxu0 }
 0x103   : > { %v1220_v60 = vadd.f32 %v1219_v47, %v1206_v57  ;;  %v1233_v62 = vpop.f32.mrf.mxu3  ;;  %v1194_v63 = vadd.f32 %v1193_v61, %v1180_v59  ;;  %v1207_v2 = vpop.f32.mrf.mxu1 }
 0x105   : > { %v1234_v0 = vadd.f32 %v1233_v62, %v1220_v60  ;;  %v1208_v3 = vadd.f32 %v1207_v2, %v1194_v63 }
 0x107   : > { %1354 = vst [vmem:[%s3654_s13] sm:$0xff] %v1234_v0 }
 0x10a   : > { %v1221_v4 = vpop.f32.mrf.mxu2 }
 0x10b   : > { %v1222_v5 = vadd.f32 %v1221_v4, %v1208_v3  ;;  %v1235_v6 = vpop.f32.mrf.mxu3 }
 0x10d   : > { %v1236_v7 = vadd.f32 %v1235_v6, %v1222_v5 }
 0x10f   : > { %1356 = vst [vmem:[%s3654_s13 + $0x30] sm:$0xff] %v1236_v7 }
 0x11a   : > { %v1247_v8 = vpop.f32.mrf.mxu0 }
 0x11b   : > { %v1261_v9 = vpop.f32.mrf.mxu1 }
 0x11c   : > { %v1262_v13 = vadd.f32 %v1261_v9, %v1247_v8 }
 0x122   : > { %v1275_v11 = vpop.f32.mrf.mxu2  ;;  %v1249_v14 = vpop.f32.mrf.mxu0 }
 0x123   : > { %v1289_v12 = vpop.f32.mrf.mxu3  ;;  %v1263_v15 = vpop.f32.mrf.mxu1  ;;  %v1276_v16 = vadd.f32 %v1275_v11, %v1262_v13 }
 0x124   : > { %v1264_v20 = vadd.f32 %v1263_v15, %v1249_v14 }
 0x125   : > { %v1290_v19 = vadd.f32 %v1289_v12, %v1276_v16 }
 0x12a   : > { %v1277_v18 = vpop.f32.mrf.mxu2 }
 0x12b   : > { %v1291_v21 = vpop.f32.mrf.mxu3  ;;  %v1278_v25 = vadd.f32 %v1277_v18, %v1264_v20 }
 0x12d   : > { %v1292_v28 = vadd.f32 %v1291_v21, %v1278_v25 }
 0x13a   : > { %v1303_v22 = vpop.f32.mrf.mxu0 }
 0x13b   : > { %v1304_v23 = vadd.f32 %v1303_v22, %v1290_v19  ;;  %v1317_v24 = vpop.f32.mrf.mxu1 }
 0x13d   : > { %v1318_v26 = vadd.f32 %v1317_v24, %v1304_v23 }
 0x142   : > { %v1331_v27 = vpop.f32.mrf.mxu2  ;;  %v1305_v31 = vpop.f32.mrf.mxu0 }
 0x143   : > { %v1332_v29 = vadd.f32 %v1331_v27, %v1318_v26  ;;  %v1345_v30 = vpop.f32.mrf.mxu3  ;;  %v1306_v33 = vadd.f32 %v1305_v31, %v1292_v28  ;;  %v1319_v34 = vpop.f32.mrf.mxu1 }
 0x145   : > { %v1346_v32 = vadd.f32 %v1345_v30, %v1332_v29  ;;  %v1320_v35 = vadd.f32 %v1319_v34, %v1306_v33 }
 0x147   : > { %1355 = vst [vmem:[%s3654_s13 + $0x8] sm:$0xff] %v1346_v32 }
 0x14a   : > { %v1333_v36 = vpop.f32.mrf.mxu2 }
 0x14b   : > { %v1334_v37 = vadd.f32 %v1333_v36, %v1320_v35  ;;  %v1347_v38 = vpop.f32.mrf.mxu3  ;;  %1361 = sbr.rel (%p2729_p5) target bundleno = 1617 (0x651), region = 64 }
 0x14d   : > { %v1348_v40 = vadd.f32 %v1347_v38, %v1334_v37 }
 0x14f   : > { %1357 = vst [vmem:[%s3654_s13 + $0x38] sm:$0xff] %v1348_v40 }
 0x150   : > { %v1393_v41 = vld [vmem:[%s4042_s2 + $0x78] sm:$0xff]  ;;  %v1392_v1 = vld [vmem:[%s4042_s2 + $0x70] sm:$0xff]  ;;  %v1391_v17 = vld [vmem:[%s4042_s2 + $0x68] sm:$0xff]  ;;  %vm1612_vm0 = vcmask 523264   ;;  %vm1830_vm14 = vcmask 261120  }
 0x151   : > { %v1409_v42 = vld [vmem:[%s4042_s2 + $0xf8] sm:$0xff]  ;;  %1474 = vmatpush.msra.mxu0 %v1393_v41  ;;  %v1408_v45 = vld [vmem:[%s4042_s2 + $0xf0] sm:$0xff]  ;;  %v1407_v46 = vld [vmem:[%s4042_s2 + $0xe8] sm:$0xff] }
 0x152   : > { %1497 = vmatpush.msra.mxu1 %v1409_v42  ;;  %v1425_v48 = vld [vmem:[%s4042_s2 + $0x178] sm:$0xff]  ;;  %v1390_v49 = vld [vmem:[%s4042_s2 + $0x60] sm:$0xff]  ;;  %v1424_v50 = vld [vmem:[%s4042_s2 + $0x170] sm:$0xff] }
 0x153   : > { %1475 = vmatpush.msra.mxu0 %v1392_v1  ;;  %v1406_v58 = vld [vmem:[%s4042_s2 + $0xe0] sm:$0xff]  ;;  %1520 = vmatpush.msra.mxu2 %v1425_v48  ;;  %v1389_v51 = vld [vmem:[%s4042_s2 + $0x58] sm:$0xff]  ;;  %v1423_v53 = vld [vmem:[%s4042_s2 + $0x168] sm:$0xff] }
 0x154   : > { %1498 = vmatpush.msra.mxu1 %v1408_v45  ;;  %v1441_v10 = vld [vmem:[%s4042_s2 + $0x1f8] sm:$0xff]  ;;  %v1440_v54 = vld [vmem:[%s4042_s2 + $0x1f0] sm:$0xff]  ;;  %v1422_v55 = vld [vmem:[%s4042_s2 + $0x160] sm:$0xff] }
 0x155   : > { %1476 = vmatpush.msra.mxu0 %v1391_v17  ;;  %v1405_v52 = vld [vmem:[%s4042_s2 + $0xd8] sm:$0xff]  ;;  %1521 = vmatpush.msra.mxu2 %v1424_v50  ;;  %v1439_v39 = vld [vmem:[%s4042_s2 + $0x1e8] sm:$0xff]  ;;  %v1388_v44 = vld [vmem:[%s4042_s2 + $0x50] sm:$0xff] }
 0x156   : > { %1499 = vmatpush.msra.mxu1 %v1407_v46  ;;  %1543 = vmatpush.msra.mxu3 %v1441_v10  ;;  %v1404_v56 = vld [vmem:[%s4042_s2 + $0xd0] sm:$0xff]  ;;  %v1421_v43 = vld [vmem:[%s4042_s2 + $0x158] sm:$0xff]  ;;  %v1438_v57 = vld [vmem:[%s4042_s2 + $0x1e0] sm:$0xff] }
 0x157   : > { %1477 = vmatpush.msra.mxu0 %v1390_v49  ;;  %1522 = vmatpush.msra.mxu2 %v1423_v53  ;;  %v1387_v47 = vld [vmem:[%s4042_s2 + $0x48] sm:$0xff]  ;;  %v1420_v60 = vld [vmem:[%s4042_s2 + $0x150] sm:$0xff]  ;;  %v1437_v61 = vld [vmem:[%s4042_s2 + $0x1d8] sm:$0xff] }
 0x158   : > { %1500 = vmatpush.msra.mxu1 %v1406_v58  ;;  %1544 = vmatpush.msra.mxu3 %v1440_v54  ;;  %v1403_v59 = vld [vmem:[%s4042_s2 + $0xc8] sm:$0xff]  ;;  %v1386_v62 = vld [vmem:[%s4042_s2 + $0x40] sm:$0xff]  ;;  %v1436_v2 = vld [vmem:[%s4042_s2 + $0x1d0] sm:$0xff] }
 0x159   : > { %1478 = vmatpush.msra.mxu0 %v1389_v51  ;;  %1523 = vmatpush.msra.mxu2 %v1422_v55  ;;  %v1402_v63 = vld [vmem:[%s4042_s2 + $0xc0] sm:$0xff]  ;;  %v1419_v0 = vld [vmem:[%s4042_s2 + $0x148] sm:$0xff]  ;;  %v1385_v3 = vld [vmem:[%s4042_s2 + $0x38] sm:$0xff] }
 0x15a   : > { %1501 = vmatpush.msra.mxu1 %v1405_v52  ;;  %1545 = vmatpush.msra.mxu3 %v1439_v39  ;;  %v1401_v4 = vld [vmem:[%s4042_s2 + $0xb8] sm:$0xff]  ;;  %v1418_v5 = vld [vmem:[%s4042_s2 + $0x140] sm:$0xff]  ;;  %v1435_v6 = vld [vmem:[%s4042_s2 + $0x1c8] sm:$0xff] }
 0x15b   : > { %1479 = vmatpush.msra.mxu0 %v1388_v44  ;;  %1524 = vmatpush.msra.mxu2 %v1421_v43  ;;  %v1384_v7 = vld [vmem:[%s4042_s2 + $0x30] sm:$0xff]  ;;  %v1417_v9 = vld [vmem:[%s4042_s2 + $0x138] sm:$0xff]  ;;  %v1434_v11 = vld [vmem:[%s4042_s2 + $0x1c0] sm:$0xff] }
 0x15c   : > { %1502 = vmatpush.msra.mxu1 %v1404_v56  ;;  %1546 = vmatpush.msra.mxu3 %v1438_v57  ;;  %v1400_v8 = vld [vmem:[%s4042_s2 + $0xb0] sm:$0xff]  ;;  %v1383_v12 = vld [vmem:[%s4042_s2 + $0x28] sm:$0xff]  ;;  %v1433_v15 = vld [vmem:[%s4042_s2 + $0x1b8] sm:$0xff] }
 0x15d   : > { %1480 = vmatpush.msra.mxu0 %v1387_v47  ;;  %1525 = vmatpush.msra.mxu2 %v1420_v60  ;;  %v1399_v13 = vld [vmem:[%s4042_s2 + $0xa8] sm:$0xff]  ;;  %v1416_v14 = vld [vmem:[%s4042_s2 + $0x130] sm:$0xff]  ;;  %v1382_v16 = vld [vmem:[%s4042_s2 + $0x20] sm:$0xff] }
 0x15e   : > { %1503 = vmatpush.msra.mxu1 %v1403_v59  ;;  %1547 = vmatpush.msra.mxu3 %v1437_v61  ;;  %v1398_v18 = vld [vmem:[%s4042_s2 + $0xa0] sm:$0xff]  ;;  %v1415_v19 = vld [vmem:[%s4042_s2 + $0x128] sm:$0xff]  ;;  %v1432_v20 = vld [vmem:[%s4042_s2 + $0x1b0] sm:$0xff] }
 0x15f   : > { %1481 = vmatpush.msra.mxu0 %v1386_v62  ;;  %1526 = vmatpush.msra.mxu2 %v1419_v0  ;;  %v1381_v21 = vld [vmem:[%s4042_s2 + $0x18] sm:$0xff]  ;;  %v1414_v23 = vld [vmem:[%s4042_s2 + $0x120] sm:$0xff]  ;;  %v1431_v24 = vld [vmem:[%s4042_s2 + $0x1a8] sm:$0xff] }
 0x160   : > { %1504 = vmatpush.msra.mxu1 %v1402_v63  ;;  %1548 = vmatpush.msra.mxu3 %v1436_v2  ;;  %v1397_v22 = vld [vmem:[%s4042_s2 + $0x98] sm:$0xff]  ;;  %v1380_v25 = vld [vmem:[%s4042_s2 + $0x10] sm:$0xff]  ;;  %v1430_v28 = vld [vmem:[%s4042_s2 + $0x1a0] sm:$0xff] }
 0x161   : > { %1482 = vmatpush.msra.mxu0 %v1385_v3  ;;  %1527 = vmatpush.msra.mxu2 %v1418_v5  ;;  %v1396_v26 = vld [vmem:[%s4042_s2 + $0x90] sm:$0xff]  ;;  %v1413_v27 = vld [vmem:[%s4042_s2 + $0x118] sm:$0xff]  ;;  %v1379_v29 = vld [vmem:[%s4042_s2 + $0x8] sm:$0xff] }
 0x162   : > { %1505 = vmatpush.msra.mxu1 %v1401_v4  ;;  %1549 = vmatpush.msra.mxu3 %v1435_v6  ;;  %v1395_v30 = vld [vmem:[%s4042_s2 + $0x88] sm:$0xff]  ;;  %v1412_v31 = vld [vmem:[%s4042_s2 + $0x110] sm:$0xff]  ;;  %v1429_v32 = vld [vmem:[%s4042_s2 + $0x198] sm:$0xff] }
 0x163   : > { %1483 = vmatpush.msra.mxu0 %v1384_v7  ;;  %1528 = vmatpush.msra.mxu2 %v1417_v9  ;;  %v1378_v33 = vld [vmem:[%s4042_s2] sm:$0xff]  ;;  %v1457_v35 = vld [vmem:[%s4042_s2 + $0x278] sm:$0xff]  ;;  %v1411_v37 = vld [vmem:[%s4042_s2 + $0x108] sm:$0xff] }
 0x164   : > { %1506 = vmatpush.msra.mxu1 %v1400_v8  ;;  %1550 = vmatpush.msra.mxu3 %v1434_v11  ;;  %v1394_v34 = vld [vmem:[%s4042_s2 + $0x80] sm:$0xff]  ;;  %v1473_v36 = vld [vmem:[%s4042_s2 + $0x2f8] sm:$0xff]  ;;  %v1428_v38 = vld [vmem:[%s4042_s2 + $0x190] sm:$0xff] }
 0x165   : > { %1484 = vmatpush.msra.mxu0 %v1383_v12  ;;  %1529 = vmatpush.msra.mxu2 %v1416_v14  ;;  %v1456_v40 = vld [vmem:[%s4042_s2 + $0x270] sm:$0xff]  ;;  %v1410_v1 = vld [vmem:[%s4042_s2 + $0x100] sm:$0xff]  ;;  %v1427_v42 = vld [vmem:[%s4042_s2 + $0x188] sm:$0xff] }
 0x166   : > { %1507 = vmatpush.msra.mxu1 %v1399_v13  ;;  %1551 = vmatpush.msra.mxu3 %v1433_v15  ;;  %v1472_v41 = vld [vmem:[%s4042_s2 + $0x2f0] sm:$0xff]  ;;  %v1455_v45 = vld [vmem:[%s4042_s2 + $0x268] sm:$0xff]  ;;  %v1454_v17 = vld [vmem:[%s4042_s2 + $0x260] sm:$0xff] }
 0x167   : > { %1485 = vmatpush.msra.mxu0 %v1382_v16  ;;  %1530 = vmatpush.msra.mxu2 %v1415_v19  ;;  %v1471_v46 = vld [vmem:[%s4042_s2 + $0x2e8] sm:$0xff]  ;;  %v1470_v48 = vld [vmem:[%s4042_s2 + $0x2e0] sm:$0xff]  ;;  %v1368_v49 = vld [vmem:[#allocation2 + $0x10] sm:$0xff] }
 0x168   : > { %1508 = vmatpush.msra.mxu1 %v1398_v18  ;;  %1552 = vmatpush.msra.mxu3 %v1432_v20  ;;  %v1426_v58 = vld [vmem:[%s4042_s2 + $0x180] sm:$0xff]  ;;  %v1369_v50 = vld [vmem:[#allocation2 + $0x18] sm:$0xff]  ;;  %v1367_v53 = vld [vmem:[#allocation2 + $0x8] sm:$0xff] }
 0x169   : > { %1486 = vmatpush.msra.mxu0 %v1381_v21  ;;  %1531 = vmatpush.msra.mxu2 %v1414_v23  ;;  %v1366_v51 = vld [vmem:[#allocation2] sm:$0xff]  ;;  %v1453_v10 = vld [vmem:[%s4042_s2 + $0x258] sm:$0xff]  ;;  %v1452_v54 = vld [vmem:[%s4042_s2 + $0x250] sm:$0xff] }
 0x16a   : > { %1509 = vmatpush.msra.mxu1 %v1397_v22  ;;  %1553 = vmatpush.msra.mxu3 %v1431_v24  ;;  %v1469_v52 = vld [vmem:[%s4042_s2 + $0x2d8] sm:$0xff]  ;;  %v1468_v55 = vld [vmem:[%s4042_s2 + $0x2d0] sm:$0xff]  ;;  %v1451_v39 = vld [vmem:[%s4042_s2 + $0x248] sm:$0xff]  ;;  %v3203_v24 = vmov 8.0  }
 0x16b   : > { %1487 = vmatpush.msra.mxu0 %v1380_v25  ;;  %1532 = vmatpush.msra.mxu2 %v1413_v27  ;;  %v1467_v44 = vld [vmem:[%s4042_s2 + $0x2c8] sm:$0xff]  ;;  %v1374_v56 = vld [vmem:[#allocation2 + $0x40] sm:$0xff]  ;;  %v1372_v59 = vld [vmem:[#allocation2 + $0x30] sm:$0xff]  ;;  %2981 = vrcp.f32 %v3203_v24 }
 0x16c   : > { %1510 = vmatpush.msra.mxu1 %v1396_v26  ;;  %1554 = vmatpush.msra.mxu3 %v1430_v28  ;;  %v1450_v43 = vld [vmem:[%s4042_s2 + $0x240] sm:$0xff]  ;;  %v1375_v47 = vld [vmem:[#allocation2 + $0x48] sm:$0xff]  ;;  %v1449_v60 = vld [vmem:[%s4042_s2 + $0x238] sm:$0xff] }
 0x16d   : > { %1488 = vmatpush.msra.mxu0 %v1379_v29  ;;  %1533 = vmatpush.msra.mxu2 %v1412_v31  ;;  %v1466_v57 = vld [vmem:[%s4042_s2 + $0x2c0] sm:$0xff]  ;;  %v1465_v61 = vld [vmem:[%s4042_s2 + $0x2b8] sm:$0xff]  ;;  %v1448_v63 = vld [vmem:[%s4042_s2 + $0x230] sm:$0xff] }
 0x16e   : > { %1511 = vmatpush.msra.mxu1 %v1395_v30  ;;  %1555 = vmatpush.msra.mxu3 %v1429_v32  ;;  %v1373_v62 = vld [vmem:[#allocation2 + $0x38] sm:$0xff]  ;;  %v1464_v0 = vld [vmem:[%s4042_s2 + $0x2b0] sm:$0xff]  ;;  %v1447_v2 = vld [vmem:[%s4042_s2 + $0x228] sm:$0xff] }
 0x16f   : > { %1489 = vmatpush.msra.mxu0 %v1378_v33  ;;  %1534 = vmatpush.msra.mxu2 %v1411_v37  ;;  %v1463_v3 = vld [vmem:[%s4042_s2 + $0x2a8] sm:$0xff]  ;;  %v1446_v4 = vld [vmem:[%s4042_s2 + $0x220] sm:$0xff]  ;;  %v1445_v6 = vld [vmem:[%s4042_s2 + $0x218] sm:$0xff] }
 0x170   : > { %1512 = vmatpush.msra.mxu1 %v1394_v34  ;;  %1556 = vmatpush.msra.mxu3 %v1428_v38  ;;  %v1462_v5 = vld [vmem:[%s4042_s2 + $0x2a0] sm:$0xff]  ;;  %v1461_v7 = vld [vmem:[%s4042_s2 + $0x298] sm:$0xff]  ;;  %v1444_v8 = vld [vmem:[%s4042_s2 + $0x210] sm:$0xff] }
 0x171   : > { %1566 = vmatpush.msrb.mxu0 %v1457_v35  ;;  %1535 = vmatpush.msra.mxu2 %v1410_v1  ;;  %v1460_v9 = vld [vmem:[%s4042_s2 + $0x290] sm:$0xff]  ;;  %v1443_v11 = vld [vmem:[%s4042_s2 + $0x208] sm:$0xff]  ;;  %v1442_v13 = vld [vmem:[%s4042_s2 + $0x200] sm:$0xff]  ;;  %v2982_v29 = vpop.eup %2981 }
 0x172   : > { %1589 = vmatpush.msrb.mxu1 %v1473_v36  ;;  %1557 = vmatpush.msra.mxu3 %v1427_v42  ;;  %v1459_v12 = vld [vmem:[%s4042_s2 + $0x288] sm:$0xff]  ;;  %v1458_v14 = vld [vmem:[%s4042_s2 + $0x280] sm:$0xff]  ;;  %v1376_v18 = vld [vmem:[#allocation2 + $0x50] sm:$0xff]  ;;  %v1621_v33 = vmul.f32 8.0, %v2982_v29  ;;  %vm1625_vm1 = vweird.f32 %v2982_v29 }
 0x173   : > { %1567 = vmatpush.msrb.mxu0 %v1456_v40  ;;  %1536 = vmatmul.f32.vlgmr.msra.gmra.mxu2 %v1368_v49  ;;  %v1370_v15 = vld [vmem:[#allocation2 + $0x20] sm:$0xff]  ;;  %v1371_v16 = vld [vmem:[#allocation2 + $0x28] sm:$0xff]  ;;  %v1377_v19 = vld [vmem:[#allocation2 + $0x58] sm:$0xff] }
 0x174   : > { %1590 = vmatpush.msrb.mxu1 %v1472_v41  ;;  %1558 = vmatpush.msra.mxu3 %v1426_v58  ;;  %v1622_v40 = vsub.f32 1.0, %v1621_v33 }
 0x175   : > { %1568 = vmatpush.msrb.mxu0 %v1455_v45  ;;  %1559 = vmatmul.f32.vlgmr.msra.gmra.mxu3 %v1369_v50 }
 0x176   : > { %1591 = vmatpush.msrb.mxu1 %v1471_v46  ;;  %1490 = vmatmul.f32.vlgmr.msra.gmra.mxu0 %v1366_v51 }
 0x177   : > { %1569 = vmatpush.msrb.mxu0 %v1454_v17  ;;  %1513 = vmatmul.f32.vlgmr.msra.gmra.mxu1 %v1367_v53  ;;  %v1623_v17 = vmul.f32 %v2982_v29, %v1622_v40  ;;  %v2977_v40 = vld [vmem:[#allocation8] ss:$0 sm:$0xff] }
 0x178   : > { %1592 = vmatpush.msrb.mxu1 %v1470_v48 }
 0x179   : > { %1570 = vmatpush.msrb.mxu0 %v1453_v10  ;;  %v1624_v51 = vadd.f32 %v2982_v29, %v1623_v17 }
 0x17a   : > { %1593 = vmatpush.msrb.mxu1 %v1469_v52 }
 0x17b   : > { %1571 = vmatpush.msrb.mxu0 %v1452_v54  ;;  %1539 = vmatmul.f32.gmra.mxu2 %v1374_v56 }
 0x17c   : > { %1594 = vmatpush.msrb.mxu1 %v1468_v55 }
 0x17d   : > { %1572 = vmatpush.msrb.mxu0 %v1451_v39  ;;  %1562 = vmatmul.f32.gmra.mxu3 %v1375_v47  ;;  %v3951_v39 = vsel %vm1625_vm1, %v2982_v29, %v1624_v51  ;;  %v1695_v47 = vld [vmem:[#allocation9 + $0x38] sm:$0xff] }
 0x17e   : > { %1595 = vmatpush.msrb.mxu1 %v1467_v44  ;;  %1493 = vmatmul.f32.gmra.mxu0 %v1372_v59 }
 0x17f   : > { %1573 = vmatpush.msrb.mxu0 %v1450_v43  ;;  %1516 = vmatmul.f32.gmra.mxu1 %v1373_v62 }
 0x180   : > { %1596 = vmatpush.msrb.mxu1 %v1466_v57  ;;  %1710 = vmatpush.msrb.mxu3 %v1695_v47 }
 0x181   : > { %1574 = vmatpush.msrb.mxu0 %v1449_v60 }
 0x182   : > { %1597 = vmatpush.msrb.mxu1 %v1465_v61  ;;  %v1694_v61 = vld [vmem:[#allocation9 + $0x30] sm:$0xff] }
 0x183   : > { %1575 = vmatpush.msrb.mxu0 %v1448_v63  ;;  %1711 = vmatpush.msrb.mxu3 %v1694_v61 }
 0x184   : > { %1598 = vmatpush.msrb.mxu1 %v1464_v0  ;;  %v1693_v0 = vld [vmem:[#allocation9 + $0x28] sm:$0xff] }
 0x185   : > { %1576 = vmatpush.msrb.mxu0 %v1447_v2  ;;  %1712 = vmatpush.msrb.mxu3 %v1693_v0 }
 0x186   : > { %1599 = vmatpush.msrb.mxu1 %v1463_v3 }
 0x187   : > { %1577 = vmatpush.msrb.mxu0 %v1446_v4 }
 0x188   : > { %1600 = vmatpush.msrb.mxu1 %v1462_v5  ;;  %v1692_v5 = vld [vmem:[#allocation9 + $0x20] sm:$0xff] }
 0x189   : > { %1578 = vmatpush.msrb.mxu0 %v1445_v6  ;;  %1713 = vmatpush.msrb.mxu3 %v1692_v5 }
 0x18a   : > { %1601 = vmatpush.msrb.mxu1 %v1461_v7 }
 0x18b   : > { %1579 = vmatpush.msrb.mxu0 %v1444_v8  ;;  %v1691_v8 = vld [vmem:[#allocation9 + $0x18] sm:$0xff] }
 0x18c   : > { %1602 = vmatpush.msrb.mxu1 %v1460_v9  ;;  %1714 = vmatpush.msrb.mxu3 %v1691_v8 }
 0x18d   : > { %1580 = vmatpush.msrb.mxu0 %v1443_v11 }
 0x18e   : > { %1603 = vmatpush.msrb.mxu1 %v1459_v12  ;;  %v1690_v12 = vld [vmem:[#allocation9 + $0x10] sm:$0xff] }
 0x18f   : > { %1581 = vmatpush.msrb.mxu0 %v1442_v13  ;;  %1715 = vmatpush.msrb.mxu3 %v1690_v12 }
 0x190   : > { %1604 = vmatpush.msrb.mxu1 %v1458_v14  ;;  %1582 = vmatmul.f32.vlgmr.msrb.gmra.mxu0 %v1370_v15  ;;  %v1689_v15 = vld [vmem:[#allocation9 + $0x8] sm:$0xff] }
 0x191   : > { %1605 = vmatmul.f32.vlgmr.msrb.gmra.mxu1 %v1371_v16  ;;  %1716 = vmatpush.msrb.mxu3 %v1689_v15  ;;  %v1797_v15 = vld [vmem:[%s4045_s5 + $0x20] sm:$0xff] }
 0x198   : > { %1585 = vmatmul.f32.gmra.mxu0 %v1376_v18 }
 0x199   : > { %1608 = vmatmul.f32.gmra.mxu1 %v1377_v19 }
 0x1f3   : > { %v1491_v20 = vpop.f32.mrf.mxu0 }
 0x1f4   : > { %v1514_v21 = vpop.f32.mrf.mxu1 }
 0x1f5   : > { %v1515_v25 = vadd.f32 %v1514_v21, %v1491_v20  ;;  %v1688_v20 = vld [vmem:[#allocation9] sm:$0xff] }
 0x1f6   : > { %v1537_v22 = vpop.f32.mrf.mxu2  ;;  %1717 = vmatpush.msrb.mxu3 %v1688_v20 }
 0x1f7   : > { %v1538_v28 = vadd.f32 %v1537_v22, %v1515_v25 }
 0x1f8   : > { %v1560_v27 = vpop.f32.mrf.mxu3 }
 0x1f9   : > { %v1561_v30 = vadd.f32 %v1560_v27, %v1538_v28 }
 0x1fb   : > { %v1494_v23 = vpop.f32.mrf.mxu0 }
 0x1fc   : > { %v1517_v26 = vpop.f32.mrf.mxu1 }
 0x1fd   : > { %v1518_v31 = vadd.f32 %v1517_v26, %v1494_v23 }
 0x1fe   : > { %v1540_v32 = vpop.f32.mrf.mxu2 }
 0x1ff   : > { %v1541_v37 = vadd.f32 %v1540_v32, %v1518_v31 }
 0x200   : > { %v1563_v41 = vpop.f32.mrf.mxu3 }
 0x201   : > { %v1564_v45 = vadd.f32 %v1563_v41, %v1541_v37 }
 0x20d   : > { %v1583_v34 = vpop.f32.mrf.mxu0 }
 0x20e   : > { %v1606_v35 = vpop.f32.mrf.mxu1  ;;  %v1584_v36 = vadd.f32 %v1583_v34, %v1561_v30 }
 0x210   : > { %v1607_v38 = vadd.f32 %v1606_v35, %v1584_v36 }
 0x212   : > { %v1613_v1 = vsel %vm1612_vm0, %v1607_v38, 0.0 }
 0x213   : > { %v1614_v42 = vrot.slane %v1613_v1, 4 }
 0x215   : > { %v1615_v46 = vadd.f32 %v1614_v42, %v1613_v1  ;;  %v1586_v48 = vpop.f32.mrf.mxu0 }
 0x216   : > { %v1609_v49 = vpop.f32.mrf.mxu1  ;;  %v1587_v58 = vadd.f32 %v1586_v48, %v1564_v45  ;;  %v2978_v45 = vld [vmem:[#allocation8 + $0x1] ss:$0 sm:$0xff] }
 0x217   : > { %v1616_v50 = vrot.slane %v1615_v46, 2 }
 0x218   : > { %v1610_v10 = vadd.f32 %v1609_v49, %v1587_v58 }
 0x219   : > { %v1617_v52 = vadd.f32 %v1616_v50, %v1615_v46 }
 0x21a   : > { %v1650_v53 = vsel %vm1612_vm0, %v1610_v10, 0.0 }
 0x21b   : > { %v1618_v54 = vrot.slane %v1617_v52, 1  ;;  %v1651_v55 = vrot.slane %v1650_v53, 4 }
 0x21d   : > { %v1619_v44 = vadd.f32 %v1618_v54, %v1617_v52  ;;  %v1652_v56 = vadd.f32 %v1651_v55, %v1650_v53 }
 0x21f   : > { %v1627_v43 = vmul.f32 %v3951_v39, %v1619_v44  ;;  %v1653_v57 = vrot.slane %v1652_v56, 2 }
 0x221   : > { %v1628_v59 = vsub.f32 %v1607_v38, %v1627_v43  ;;  %v1654_v60 = vadd.f32 %v1653_v57, %v1652_v56 }
 0x223   : > { %v1629_v62 = vmul.f32 %v1628_v59, %v1628_v59  ;;  %v1655_v63 = vrot.slane %v1654_v60, 1 }
 0x225   : > { %v1630_v2 = vsel %vm1612_vm0, %v1629_v62, 0.0  ;;  %v1656_v3 = vadd.f32 %v1655_v63, %v1654_v60 }
 0x226   : > { %v1631_v4 = vrot.slane %v1630_v2, 4 }
 0x227   : > { %v1657_v6 = vmul.f32 %v1656_v3, %v3951_v39 }
 0x228   : > { %v1632_v7 = vadd.f32 %v1631_v4, %v1630_v2  ;;  %v1800_v4 = vld [vmem:[%s4045_s5 + $0x38] sm:$0xff] }
 0x229   : > { %v1658_v9 = vsub.f32 %v1610_v10, %v1657_v6  ;;  %1815 = vmatpush.msra.mxu3 %v1800_v4 }
 0x22a   : > { %v1633_v11 = vrot.slane %v1632_v7, 2 }
 0x22b   : > { %v1659_v13 = vmul.f32 %v1658_v9, %v1658_v9 }
 0x22c   : > { %v1634_v14 = vadd.f32 %v1633_v11, %v1632_v7  ;;  %v1799_v7 = vld [vmem:[%s4045_s5 + $0x30] sm:$0xff]  ;;  %v1798_v11 = vld [vmem:[%s4045_s5 + $0x28] sm:$0xff] }
 0x22d   : > { %v1660_v16 = vsel %vm1612_vm0, %v1659_v13, 0.0  ;;  %1816 = vmatpush.msra.mxu3 %v1799_v7 }
 0x22e   : > { %v1635_v18 = vrot.slane %v1634_v14, 1  ;;  %v1661_v19 = vrot.slane %v1660_v16, 4 }
 0x22f   : > { %1817 = vmatpush.msra.mxu3 %v1798_v11 }
 0x230   : > { %v1636_v21 = vadd.f32 %v1635_v18, %v1634_v14  ;;  %v1662_v22 = vadd.f32 %v1661_v19, %v1660_v16  ;;  %v1796_v19 = vld [vmem:[%s4045_s5 + $0x18] sm:$0xff] }
 0x231   : > { %1818 = vmatpush.msra.mxu3 %v1797_v15 }
 0x232   : > { %v1637_v23 = vmul.f32 %v1636_v21, %v3951_v39  ;;  %v1663_v24 = vrot.slane %v1662_v22, 2 }
 0x233   : > { %1819 = vmatpush.msra.mxu3 %v1796_v19 }
 0x234   : > { %v1638_v25 = vadd.f32 1e-05, %v1637_v23  ;;  %v1664_v26 = vadd.f32 %v1663_v24, %v1662_v22  ;;  %v1795_v22 = vld [vmem:[%s4045_s5 + $0x10] sm:$0xff] }
 0x235   : > { %1820 = vmatpush.msra.mxu3 %v1795_v22 }
 0x236   : > { %2983 = vrsqrt.f32 %v1638_v25  ;;  %v1665_v27 = vrot.slane %v1664_v26, 1  ;;  %vm1645_vm3 = vweird.f32 %v1638_v25 }
 0x238   : > { %v1666_v28 = vadd.f32 %v1665_v27, %v1664_v26 }
 0x23a   : > { %v1667_v29 = vmul.f32 %v1666_v28, %v3951_v39 }
 0x23c   : > { %v2984_v30 = vpop.eup %2983  ;;  %v1668_v31 = vadd.f32 1e-05, %v1667_v29  ;;  %v1793_v29 = vld [vmem:[%s4045_s5] sm:$0xff] }
 0x23d   : > { %v1640_v32 = vmul.f32 %v2984_v30, %v1638_v25  ;;  %vm1646_vm2 = vweird.f32 %v2984_v30  ;;  %v1794_v25 = vld [vmem:[%s4045_s5 + $0x8] sm:$0xff] }
 0x23e   : > { %2985 = vrsqrt.f32 %v1668_v31  ;;  %vm1647_vm4 = vmor %vm1645_vm3, %vm1646_vm2  ;;  %vm1675_vm6 = vweird.f32 %v1668_v31  ;;  %1821 = vmatpush.msra.mxu3 %v1794_v25 }
 0x23f   : > { %v1641_v33 = vmul.f32 %v2984_v30, %v1640_v32 }
 0x240   : > { %1822 = vmatpush.msra.mxu3 %v1793_v29 }
 0x241   : > { %v1642_v34 = vmul.f32 0.5, %v1641_v33 }
 0x243   : > { %v1643_v35 = vsub.f32 1.5, %v1642_v34 }
 0x244   : > { %v2986_v36 = vpop.eup %2985 }
 0x245   : > { %v1644_v37 = vmul.f32 %v2984_v30, %v1643_v35  ;;  %v1670_v38 = vmul.f32 %v2986_v36, %v1668_v31  ;;  %vm1676_vm5 = vweird.f32 %v2986_v36 }
 0x246   : > { %vm1677_vm7 = vmor %vm1675_vm6, %vm1676_vm5  ;;  %vm1923_vm5 = vcmask 64512  }
 0x247   : > { %v1648_v41 = vsel %vm1647_vm4, %v2984_v30, %v1644_v37  ;;  %v1671_v1 = vmul.f32 %v2986_v36, %v1670_v38 }
 0x248   : > { %v1649_v42 = vmul.f32 %v1648_v41, %v1628_v59 }
 0x249   : > { %v1672_v17 = vmul.f32 0.5, %v1671_v1 }
 0x24a   : > { %v1681_v46 = vmul.f32 %v2977_v40, %v1649_v42 }
 0x24b   : > { %v1673_v48 = vsub.f32 1.5, %v1672_v17 }
 0x24c   : > { %v1684_v49 = vadd.f32 %v2978_v45, %v1681_v46 }
 0x24d   : > { %v1674_v58 = vmul.f32 %v2986_v36, %v1673_v48 }
 0x24e   : > { %v1686_v50 = vmax.f32 %v1684_v49, 0.0 }
 0x24f   : > { %v1678_v51 = vsel %vm1677_vm7, %v2986_v36, %v1674_v58  ;;  %v2979_v58 = vld [vmem:[#allocation8 + $0x2] ss:$0 sm:$0xff] }
 0x250   : > { %v1679_v10 = vmul.f32 %v1678_v51, %v1658_v9  ;;  %2730 = vmatmul.msk.f32.vlgmr.msrb.gmra.mxu3 %vm1612_vm0, %v1686_v50 }
 0x252   : > { %v1682_v52 = vmul.f32 %v2977_v40, %v1679_v10 }
 0x254   : > { %v1685_v53 = vadd.f32 %v2978_v45, %v1682_v52  ;;  %v2980_v52 = vld [vmem:[#allocation8 + $0x3] ss:$0 sm:$0xff] }
 0x256   : > { %v1687_v54 = vmax.f32 %v1685_v53, 0.0 }
 0x258   : > { %2731 = vmatmul.msk.f32.gmra.mxu3 %vm1612_vm0, %v1687_v54 }
 0x2d3   : > { %v1719_v55 = vpop.f32.mrf.mxu3 }
 0x2d4   : > { %v1725_v44 = vsel %vm1612_vm0, %v1719_v55, 0.0 }
 0x2d5   : > { %v1726_v56 = vrot.slane %v1725_v44, 4 }
 0x2d7   : > { %v1727_v43 = vadd.f32 %v1726_v56, %v1725_v44 }
 0x2d9   : > { %v1728_v57 = vrot.slane %v1727_v43, 2 }
 0x2db   : > { %v1729_v47 = vadd.f32 %v1728_v57, %v1727_v43  ;;  %v1722_v59 = vpop.f32.mrf.mxu3 }
 0x2dc   : > { %v1755_v60 = vsel %vm1612_vm0, %v1722_v59, 0.0 }
 0x2dd   : > { %v1730_v61 = vrot.slane %v1729_v47, 1  ;;  %v1756_v62 = vrot.slane %v1755_v60, 4 }
 0x2df   : > { %v1731_v63 = vadd.f32 %v1730_v61, %v1729_v47  ;;  %v1757_v0 = vadd.f32 %v1756_v62, %v1755_v60 }
 0x2e1   : > { %v1732_v2 = vmul.f32 %v1731_v63, %v3951_v39  ;;  %v1758_v3 = vrot.slane %v1757_v0, 2 }
 0x2e3   : > { %v1733_v5 = vsub.f32 %v1719_v55, %v1732_v2  ;;  %v1759_v6 = vadd.f32 %v1758_v3, %v1757_v0 }
 0x2e5   : > { %v1734_v8 = vmul.f32 %v1733_v5, %v1733_v5  ;;  %v1760_v9 = vrot.slane %v1759_v6, 1 }
 0x2e7   : > { %v1735_v12 = vsel %vm1612_vm0, %v1734_v8, 0.0  ;;  %v1761_v13 = vadd.f32 %v1760_v9, %v1759_v6 }
 0x2e8   : > { %v1736_v14 = vrot.slane %v1735_v12, 4 }
 0x2e9   : > { %v1762_v16 = vmul.f32 %v1761_v13, %v3951_v39 }
 0x2ea   : > { %v1737_v18 = vadd.f32 %v1736_v14, %v1735_v12 }
 0x2eb   : > { %v1763_v20 = vsub.f32 %v1722_v59, %v1762_v16 }
 0x2ec   : > { %v1738_v21 = vrot.slane %v1737_v18, 2 }
 0x2ed   : > { %v1764_v23 = vmul.f32 %v1763_v20, %v1763_v20 }
 0x2ee   : > { %v1739_v24 = vadd.f32 %v1738_v21, %v1737_v18 }
 0x2ef   : > { %v1765_v26 = vsel %vm1612_vm0, %v1764_v23, 0.0 }
 0x2f0   : > { %v1740_v27 = vrot.slane %v1739_v24, 1  ;;  %v1766_v28 = vrot.slane %v1765_v26, 4 }
 0x2f2   : > { %v1741_v30 = vadd.f32 %v1740_v27, %v1739_v24  ;;  %v1767_v31 = vadd.f32 %v1766_v28, %v1765_v26 }
 0x2f4   : > { %v1742_v32 = vmul.f32 %v1741_v30, %v3951_v39  ;;  %v1768_v33 = vrot.slane %v1767_v31, 2 }
 0x2f6   : > { %v1743_v34 = vadd.f32 1e-05, %v1742_v32  ;;  %v1769_v35 = vadd.f32 %v1768_v33, %v1767_v31 }
 0x2f8   : > { %2987 = vrsqrt.f32 %v1743_v34  ;;  %v1770_v36 = vrot.slane %v1769_v35, 1  ;;  %vm1750_vm9 = vweird.f32 %v1743_v34 }
 0x2fa   : > { %v1771_v37 = vadd.f32 %v1770_v36, %v1769_v35 }
 0x2fc   : > { %v1772_v38 = vmul.f32 %v1771_v37, %v3951_v39 }
 0x2fe   : > { %v2988_v40 = vpop.eup %2987  ;;  %v1773_v41 = vadd.f32 1e-05, %v1772_v38 }
 0x2ff   : > { %v1745_v1 = vmul.f32 %v2988_v40, %v1743_v34  ;;  %vm1751_vm8 = vweird.f32 %v2988_v40 }
 0x300   : > { %2989 = vrsqrt.f32 %v1773_v41  ;;  %vm1752_vm10 = vmor %vm1750_vm9, %vm1751_vm8  ;;  %vm1780_vm12 = vweird.f32 %v1773_v41 }
 0x301   : > { %v1746_v42 = vmul.f32 %v2988_v40, %v1745_v1 }
 0x303   : > { %v1747_v45 = vmul.f32 0.5, %v1746_v42 }
 0x305   : > { %v1748_v17 = vsub.f32 1.5, %v1747_v45 }
 0x306   : > { %v2990_v46 = vpop.eup %2989 }
 0x307   : > { %v1749_v48 = vmul.f32 %v2988_v40, %v1748_v17  ;;  %v1775_v49 = vmul.f32 %v2990_v46, %v1773_v41  ;;  %vm1781_vm11 = vweird.f32 %v2990_v46 }
 0x308   : > { %vm1782_vm13 = vmor %vm1780_vm12, %vm1781_vm11  ;;  %vm2075_vm11 = vcmask 0  }
 0x309   : > { %v1753_v50 = vsel %vm1752_vm10, %v2988_v40, %v1749_v48  ;;  %v1776_v51 = vmul.f32 %v2990_v46, %v1775_v49  ;;  %vm2012_vm10 = vcmask 7168  }
 0x30a   : > { %v1754_v10 = vmul.f32 %v1753_v50, %v1733_v5 }
 0x30b   : > { %v1777_v53 = vmul.f32 0.5, %v1776_v51 }
 0x30c   : > { %v1786_v54 = vmul.f32 %v2979_v58, %v1754_v10 }
 0x30d   : > { %v1778_v55 = vsub.f32 1.5, %v1777_v53 }
 0x30e   : > { %v1789_v44 = vadd.f32 %v2980_v52, %v1786_v54 }
 0x30f   : > { %v1779_v56 = vmul.f32 %v2990_v46, %v1778_v55 }
 0x310   : > { %v1791_v43 = vmax.f32 %v1789_v44, 0.0 }
 0x311   : > { %v1783_v57 = vsel %vm1782_vm13, %v2990_v46, %v1779_v56 }
 0x312   : > { %v1784_v47 = vmul.f32 %v1783_v57, %v1763_v20  ;;  %2732 = vmatmul.msk.f32.vlgmr.msra.gmra.mxu3 %vm1612_vm0, %v1791_v43 }
 0x314   : > { %v1787_v59 = vmul.f32 %v2979_v58, %v1784_v47 }
 0x316   : > { %v1790_v60 = vadd.f32 %v2980_v52, %v1787_v59  ;;  %v1969_v59 = vlaneseq }
 0x318   : > { %v1792_v61 = vmax.f32 %v1790_v60, 0.0  ;;  %v1970_v60 = vshrl.u32 %v1969_v59, 7 }
 0x31a   : > { %2733 = vmatmul.msk.f32.gmra.mxu3 %vm1612_vm0, %v1792_v61  ;;  %v1975_v61 = vand.u32 127, %v1969_v59 }
 0x31c   : > { %vm1976_vm6 = vcmp.eq.s32.totalorder %v1970_v60, %v1975_v61 }
 0x395   : > { %v1824_v62 = vpop.f32.mrf.mxu3 }
 0x396   : > { %v1831_v63 = vsel %vm1830_vm14, %v1824_v62, 0.0 }
 0x397   : > { %v1832_v0 = vrot.slane %v1831_v63, 4 }
 0x399   : > { %v1833_v2 = vadd.f32 %v1832_v0, %v1831_v63  ;;  %v3204_v63 = vmov 0.0  }
 0x39a   : > { %v2738_v0 = vsel %vm1976_vm6, 1.0, %v3204_v63 }
 0x39b   : > { %v1834_v3 = vrot.slane %v1833_v2, 2 }
 0x39d   : > { %v1835_v4 = vadd.f32 %v1834_v3, %v1833_v2  ;;  %v1827_v5 = vpop.f32.mrf.mxu3  ;;  %v1971_v3 = vadd.s32 8, %v1970_v60 }
 0x39e   : > { %v1861_v6 = vsel %vm1830_vm14, %v1827_v5, 0.0 }
 0x39f   : > { %v1836_v7 = vrot.slane %v1835_v4, 1  ;;  %v1862_v8 = vrot.slane %v1861_v6, 4  ;;  %vm1977_vm7 = vcmp.eq.s32.totalorder %v1971_v3, %v1975_v61 }
 0x3a1   : > { %v1837_v9 = vadd.f32 %v1836_v7, %v1835_v4  ;;  %v1863_v11 = vadd.f32 %v1862_v8, %v1861_v6  ;;  %v2739_v7 = vsel %vm1977_vm7, 1.0, %v3204_v63 }
 0x3a3   : > { %v1838_v12 = vmul.f32 %v1837_v9, %v3951_v39  ;;  %v1864_v13 = vrot.slane %v1863_v11, 2  ;;  %v1972_v9 = vadd.s32 16, %v1970_v60 }
 0x3a5   : > { %v1839_v14 = vsub.f32 %v1824_v62, %v1838_v12  ;;  %v1865_v15 = vadd.f32 %v1864_v13, %v1863_v11  ;;  %vm1978_vm8 = vcmp.eq.s32.totalorder %v1972_v9, %v1975_v61 }
 0x3a7   : > { %v1840_v16 = vmul.f32 %v1839_v14, %v1839_v14  ;;  %v1866_v18 = vrot.slane %v1865_v15, 1 }
 0x3a9   : > { %v1841_v19 = vsel %vm1830_vm14, %v1840_v16, 0.0  ;;  %v1867_v20 = vadd.f32 %v1866_v18, %v1865_v15  ;;  %v1973_v16 = vadd.s32 24, %v1970_v60 }
 0x3aa   : > { %v1842_v21 = vrot.slane %v1841_v19, 4 }
 0x3ab   : > { %v1868_v22 = vmul.f32 %v1867_v20, %v3951_v39  ;;  %vm1979_vm9 = vcmp.eq.s32.totalorder %v1973_v16, %v1975_v61 }
 0x3ac   : > { %v1843_v23 = vadd.f32 %v1842_v21, %v1841_v19 }
 0x3ad   : > { %v1869_v24 = vsub.f32 %v1827_v5, %v1868_v22 }
 0x3ae   : > { %v1844_v25 = vrot.slane %v1843_v23, 2 }
 0x3af   : > { %v1870_v26 = vmul.f32 %v1869_v24, %v1869_v24 }
 0x3b0   : > { %v1845_v27 = vadd.f32 %v1844_v25, %v1843_v23  ;;  %v2741_v25 = vsel %vm1979_vm9, 1.0, %v3204_v63 }
 0x3b1   : > { %v1871_v28 = vsel %vm1830_vm14, %v1870_v26, 0.0 }
 0x3b2   : > { %v1846_v29 = vrot.slane %v1845_v27, 1  ;;  %v1872_v30 = vrot.slane %v1871_v28, 4 }
 0x3b4   : > { %v1847_v31 = vadd.f32 %v1846_v29, %v1845_v27  ;;  %v1873_v32 = vadd.f32 %v1872_v30, %v1871_v28 }
 0x3b6   : > { %v1874_v33 = vrot.slane %v1873_v32, 2  ;;  %v1848_v34 = vmul.f32 %v1847_v31, %v3951_v39 }
 0x3b8   : > { %v1875_v35 = vadd.f32 %v1874_v33, %v1873_v32  ;;  %v1849_v36 = vadd.f32 1e-05, %v1848_v34 }
 0x3ba   : > { %v1876_v37 = vrot.slane %v1875_v35, 1  ;;  %2991 = vrsqrt.f32 %v1849_v36  ;;  %vm1856_vm0 = vweird.f32 %v1849_v36 }
 0x3bc   : > { %v1877_v38 = vadd.f32 %v1876_v37, %v1875_v35 }
 0x3be   : > { %v1878_v40 = vmul.f32 %v1877_v38, %v3951_v39 }
 0x3c0   : > { %v2992_v41 = vpop.eup %2991  ;;  %v1879_v1 = vadd.f32 1e-05, %v1878_v40 }
 0x3c1   : > { %v1851_v42 = vmul.f32 %v2992_v41, %v1849_v36  ;;  %vm1857_vm15 = vweird.f32 %v2992_v41 }
 0x3c2   : > { %2993 = vrsqrt.f32 %v1879_v1  ;;  %vm1858_vm1 = vmor %vm1856_vm0, %vm1857_vm15  ;;  %vm1886_vm3 = vweird.f32 %v1879_v1 }
 0x3c3   : > { %v1852_v45 = vmul.f32 %v2992_v41, %v1851_v42 }
 0x3c5   : > { %v1853_v17 = vmul.f32 0.5, %v1852_v45 }
 0x3c7   : > { %v1854_v46 = vsub.f32 1.5, %v1853_v17 }
 0x3c8   : > { %v2994_v48 = vpop.eup %2993 }
 0x3c9   : > { %v1855_v49 = vmul.f32 %v2992_v41, %v1854_v46  ;;  %v1881_v58 = vmul.f32 %v2994_v48, %v1879_v1  ;;  %vm1887_vm2 = vweird.f32 %v2994_v48 }
 0x3ca   : > { %vm1888_vm4 = vmor %vm1886_vm3, %vm1887_vm2 }
 0x3cb   : > { %v1859_v50 = vsel %vm1858_vm1, %v2992_v41, %v1855_v49  ;;  %v1882_v51 = vmul.f32 %v2994_v48, %v1881_v58 }
 0x3cc   : > { %v1860_v10 = vmul.f32 %v1859_v50, %v1839_v14  ;;  %v2740_v14 = vsel %vm1978_vm8, 1.0, %v3204_v63 }
 0x3cd   : > { %v1883_v52 = vmul.f32 0.5, %v1882_v51 }
 0x3ce   : > { %1891 = vxpose.xlu0.b32.start.end [1/1] (short) (narrow) %v1860_v10, 32 }
 0x3cf   : > { %v1884_v53 = vsub.f32 1.5, %v1883_v52 }
 0x3d1   : > { %v1885_v54 = vmul.f32 %v2994_v48, %v1884_v53 }
 0x3d3   : > { %v1889_v55 = vsel %vm1888_vm4, %v2994_v48, %v1885_v54 }
 0x3d4   : > { %v1890_v44 = vmul.f32 %v1889_v55, %v1869_v24 }
 0x3d6   : > { %1951 = vmatpush.msrb.mxu2 %v1890_v44 }
 0x472   : > { %v1907_v56 = vpop.trf.xlu0 }
 0x473   : > { %2734 = vmatmul.msk.f32.vlgmr.msrb.gmra.mxu2 %vm1923_vm5, %v1907_v56 }
 0x47a   : > { %v1908_v43 = vpop.trf.xlu0 }
 0x47b   : > { %2735 = vmatmul.msk.f32.gmra.mxu2 %vm1923_vm5, %v1908_v43 }
 0x482   : > { %v1909_v57 = vpop.trf.xlu0 }
 0x483   : > { %2736 = vmatmul.msk.f32.gmra.mxu2 %vm1923_vm5, %v1909_v57 }
 0x48a   : > { %v1910_v47 = vpop.trf.xlu0 }
 0x48b   : > { %2737 = vmatmul.msk.f32.gmra.mxu2 %vm1923_vm5, %v1910_v47 }
 0x4f6   : > { %v1953_v62 = vpop.f32.mrf.mxu2 }
 0x4f7   : > { %v1965_v2 = vmul.f32 %v1953_v62, %v3951_v39 }
 0x4f9   : > { %v1988_v4 = vmul.f32 %v2738_v0, %v1965_v2  ;;  %v2030_v20 = vmul.f32 %v1965_v2, %v1965_v2 }
 0x4fb   : > { %v1992_v5 = vsel %vm1830_vm14, %v1988_v4, 0.0  ;;  %v2034_v26 = vsel %vm1830_vm14, %v2030_v20, 0.0 }
 0x4fc   : > { %1993 = vadd.xlane.f32.xlu0 %v1992_v5 }
 0x4fe   : > { %v1956_v6 = vpop.f32.mrf.mxu2 }
 0x4ff   : > { %v1966_v8 = vmul.f32 %v1956_v6, %v3951_v39 }
 0x501   : > { %v1989_v11 = vmul.f32 %v2739_v7, %v1966_v8  ;;  %v2031_v18 = vmul.f32 %v1966_v8, %v1966_v8 }
 0x503   : > { %v1995_v12 = vsel %vm1830_vm14, %v1989_v11, 0.0  ;;  %v2035_v23 = vsel %vm1830_vm14, %v2031_v18, 0.0 }
 0x504   : > { %1996 = vadd.xlane.f32.xlu1 %v1995_v12  ;;  %v2036_v29 = vadd.f32 %v2035_v23, %v2034_v26 }
 0x506   : > { %v1959_v13 = vpop.f32.mrf.mxu2 }
 0x507   : > { %v1967_v15 = vmul.f32 %v1959_v13, %v3951_v39 }
 0x509   : > { %v1990_v19 = vmul.f32 %v2740_v14, %v1967_v15  ;;  %v2032_v21 = vmul.f32 %v1967_v15, %v1967_v15 }
 0x50b   : > { %v1998_v22 = vsel %vm1830_vm14, %v1990_v19, 0.0  ;;  %v2037_v28 = vsel %vm1830_vm14, %v2032_v21, 0.0 }
 0x50c   : > { %1999 = vadd.xlane.f32.xlu1 %v1998_v22  ;;  %v2038_v32 = vadd.f32 %v2037_v28, %v2036_v29 }
 0x50e   : > { %v1962_v24 = vpop.f32.mrf.mxu2 }
 0x50f   : > { %v1968_v27 = vmul.f32 %v1962_v24, %v3951_v39 }
 0x511   : > { %v2033_v30 = vmul.f32 %v1968_v27, %v1968_v27  ;;  %v1991_v31 = vmul.f32 %v2741_v25, %v1968_v27 }
 0x513   : > { %v2001_v33 = vsel %vm1830_vm14, %v1991_v31, 0.0  ;;  %v2039_v34 = vsel %vm1830_vm14, %v2033_v30, 0.0 }
 0x514   : > { %2002 = vadd.xlane.f32.xlu2 %v2001_v33  ;;  %v2040_v35 = vadd.f32 %v2039_v34, %v2038_v32 }
 0x516   : > { %2041 = vadd.xlane.f32.xlu1 %v2040_v35 }
 0x56f   : > { %v1994_v37 = vpop.xlane.xlu0 %1993 }
 0x570   : > { %v2742_v41 = vadd.f32 -1.0, %v1994_v37  ;;  %v2051_v53 = vmul.f32 %v1994_v37, %v1994_v37 }
 0x572   : > { %v2008_v42 = vmul.f32 %v2742_v41, %v2742_v41  ;;  %v2055_v57 = vsel %vm2012_vm10, %v2051_v53, 0.0 }
 0x574   : > { %v2013_v48 = vsel %vm2012_vm10, %v2008_v42, 0.0 }
 0x577   : > { %v1997_v36 = vpop.xlane.xlu1 %1996 }
 0x578   : > { %v2743_v38 = vadd.f32 -1.0, %v1997_v36  ;;  %v2052_v51 = vmul.f32 %v1997_v36, %v1997_v36 }
 0x57a   : > { %v2009_v39 = vmul.f32 %v2743_v38, %v2743_v38  ;;  %v2056_v56 = vsel %vm2012_vm10, %v2052_v51, 0.0 }
 0x57b   : > { %v2057_v59 = vadd.f32 %v2056_v56, %v2055_v57 }
 0x57c   : > { %v2014_v17 = vsel %vm2012_vm10, %v2009_v39, 0.0 }
 0x57d   : > { %v2015_v50 = vadd.f32 %v2014_v17, %v2013_v48 }
 0x57f   : > { %v2000_v40 = vpop.xlane.xlu1 %1999 }
 0x580   : > { %v2744_v1 = vadd.f32 -1.0, %v2000_v40  ;;  %v2053_v54 = vmul.f32 %v2000_v40, %v2000_v40 }
 0x582   : > { %v2010_v45 = vmul.f32 %v2744_v1, %v2744_v1  ;;  %v2058_v47 = vsel %vm2012_vm10, %v2053_v54, 0.0 }
 0x583   : > { %v2059_v61 = vadd.f32 %v2058_v47, %v2057_v59 }
 0x584   : > { %v2016_v49 = vsel %vm2012_vm10, %v2010_v45, 0.0 }
 0x585   : > { %v2017_v52 = vadd.f32 %v2016_v49, %v2015_v50 }
 0x587   : > { %v2003_v46 = vpop.xlane.xlu2 %2002 }
 0x588   : > { %v2745_v58 = vadd.f32 -1.0, %v2003_v46  ;;  %v2054_v43 = vmul.f32 %v2003_v46, %v2003_v46 }
 0x589   : > { %v2042_v63 = vpop.xlane.xlu1 %2041 }
 0x58a   : > { %v2011_v10 = vmul.f32 %v2745_v58, %v2745_v58  ;;  %v2060_v60 = vsel %vm2012_vm10, %v2054_v43, 0.0  ;;  %v2043_v0 = vrot.slane %v2042_v63, 4 }
 0x58b   : > { %v2061_v62 = vadd.f32 %v2060_v60, %v2059_v61 }
 0x58c   : > { %v2018_v55 = vsel %vm2012_vm10, %v2011_v10, 0.0  ;;  %v2044_v2 = vadd.f32 %v2043_v0, %v2042_v63 }
 0x58d   : > { %v2019_v44 = vadd.f32 %v2018_v55, %v2017_v52 }
 0x58e   : > { %v2045_v3 = vrot.slane %v2044_v2, 2 }
 0x58f   : > { %2020 = vadd.xlane.f32.xlu2 %v2019_v44 }
 0x590   : > { %v2046_v7 = vadd.f32 %v2045_v3, %v2044_v2 }
 0x592   : > { %v2047_v12 = vrot.slane %v2046_v7, 1 }
 0x594   : > { %v2048_v18 = vadd.f32 %v2047_v12, %v2046_v7 }
 0x597   : > { %2062 = vadd.xlane.f32.xlu2 %v2061_v62 }
 0x602   : > { %v2021_v4 = vpop.xlane.xlu2 %2020 }
 0x603   : > { %v2022_v5 = vrot.slane %v2021_v4, 4 }
 0x605   : > { %v2023_v6 = vadd.f32 %v2022_v5, %v2021_v4 }
 0x607   : > { %v2024_v8 = vrot.slane %v2023_v6, 2 }
 0x609   : > { %v2025_v9 = vadd.f32 %v2024_v8, %v2023_v6 }
 0x60a   : > { %v2063_v11 = vpop.xlane.xlu2 %2062 }
 0x60b   : > { %v2064_v13 = vrot.slane %v2063_v11, 4  ;;  %v2026_v14 = vrot.slane %v2025_v9, 1 }
 0x60d   : > { %v2065_v15 = vadd.f32 %v2064_v13, %v2063_v11  ;;  %v2027_v16 = vadd.f32 %v2026_v14, %v2025_v9 }
 0x60f   : > { %v2066_v19 = vrot.slane %v2065_v15, 2  ;;  %2887 = vpush %v2027_v16 }
 0x610   : > { %2889 = vpush %v2048_v18 }
 0x611   : > { %v2067_v20 = vadd.f32 %v2066_v19, %v2065_v15 }
 0x613   : > { %v2068_v21 = vrot.slane %v2067_v20, 1 }
 0x615   : > { %v2069_v22 = vadd.f32 %v2068_v21, %v2067_v20 }
 0x617   : > { %2891 = vpush %v2069_v22 }
 0x640   : > { %s2888_s8 = spop %2887 }
 0x641   : > { %s2890_s13 = spop %2889  ;;  %v2029_v27 = vstv %s2888_s8 }
 0x642   : > { %v2050_v23 = vstv %s2890_s13 }
 0x648   : > { %s2892_s15 = spop %2891 }
 0x649   : > { %v2071_v24 = vstv %s2892_s15 }
 0x64a   : > { %v2072_v25 = vsub.f32 %v2050_v23, %v2071_v24 }
 0x64c   : > { %v2073_v26 = vmul.f32 0.005, %v2072_v25 }
 0x64e   : > { %v2074_v28 = vadd.f32 %v2073_v26, %v2029_v27 }
 0x650   : > { %2076 = vst.msk [vmem:[#allocation11] sm:$0x1] %vm2075_vm11, %v2074_v28 }
 0x651 PF: > { %p2932_p8 = scmp.eq.s32.totalorder %s3260_s25, 2  ;;  %s3205_s27 = smov [#allocation11]  }
 0x652   : > { %s2083_s28 = sshll.u32 %s3205_s27, 4  ;;  %s2085_s14 = sshll.u32 %s4046_s6, 4  ;;  %s2084_s28 = int_to_ptr.vmem [resolvable:$true] %s2083_s28  ;;  %s2086_s14 = int_to_ptr.hbm [resolvable:$true] %s2085_s14 }
 0x653   : > { %2908 = dma.vmem_to_hbm [thread:$0]  (%p2932_p8), %s2084_s28, 16, %s2086_s14, [#allocation5]  }
 0x654   : > { %3176 = dma.done.wait (%p2932_p8), [#allocation5], 16  }
 0x655   : > { %3178 = vsyncadd (%p2932_p8), [#allocation5], 4294967280 }
 0x656 PF: > { %p19_p9 = scmp.ge.s32.totalorder %s3263_s26, 5   ;;  %s4056_s21 = smov %s3185_s22 }
 0x657   : > { %s4057_s22 = smov %s3189_s23  ;;  %s4058_s23 = smov %s3273_s29 }
 0x658   : > { %s4059_s24 = smov %s3263_s26  ;;  %21 = sbr.rel (!%p19_p9) target bundleno = 9 (0x9), region = 99 }
 0x65d   :  { %2099 = vsyncpa [#allocation4], 1 }
 0x65e   :  { %2101 = vsyncpa [#allocation4 + $0x1], 1 }
 0x65f   :  { %2102 = vsyncpa [#allocation7], 1 }
 0x660   :  { %2104 = vsyncpa [#allocation7 + $0x1], 1 }
 0x661   :  { %2105 = vsyncpa [#allocation10], 1 }
 0x662   :  { %2106 = vsyncpa [#allocation5], 1 }
 0x663   :  { %2108 = vsyncpa [#allocation5 + $0x1], 1 }

</bundles_post_ra>
